<compile_context>
chip_gen: v5e
topology: v5e:2x2
jax: 0.10.0
libtpu: 0.0.40
codegen_flags: <defaults>
</compile_context>

<pallas_src>
import functools

import jax
import jax.numpy as jnp
from jax import lax
from jax.experimental import pallas as pl
from jax.experimental.pallas import tpu as pltpu

LANE = 128      # TPU lane width: conv OUTPUT channels are padded to a multiple of this
BN_EPS = 1e-5   # nn.BatchNorm2d default eps
_ACC_ROWS = 256  # target rows of the flattened (TH*W) axis per accumulator sub-chunk


def _round_up(x, m):
    return (x + m - 1) // m * m


def _pick_row_tile(h, target=8):
    """Largest divisor of h that is <= target (output row-tile height)."""
    # TODO(synk): switch to a pl.cdiv grid with a masked tail tile so prime/odd heights
    # keep TH=8 (sublane-dense stores) instead of degrading to small divisors.
    t = min(h, target)
    while h % t:
        t -= 1
    return t


def _pick_vmem_limit():
    """Generation-aware scoped-VMEM budget (v5e/v6e: 128 MiB physical, v7x: 64 MiB)."""
    try:
        cap = int(pltpu.get_tpu_info().vmem_capacity_bytes)
    except Exception:
        return None            # unknown chip: keep the compiler default
    return min(100 * 1024 * 1024, (cap * 3) // 4)


# -----------------------------------------------------------------------------
# Fused 3x3 "same" conv + bias (+ ReLU) Pallas kernel.
#
# Grid: (N, H // TH).  The zero-padded input image of one batch element stays
# resident in VMEM across the row-tile axis (its block index does not depend on
# the row-tile index), while output row tiles are double-buffered and streamed
# back to HBM.  Output channels sit on the 128-lane axis -> unmasked lane-dense
# stores and full MXU tiles for every mid-network layer; the first layer keeps
# its tiny real Cin (no 128-pad of the input image).
# -----------------------------------------------------------------------------
def _conv3x3_kernel(x_ref, w_ref, b_ref, o_ref, *, apply_relu):
    # x_ref: (H+2, W+2, Cin_p)   bf16  zero-padded image (batch dim squeezed)
    # w_ref: (9, Cin_p, Cout_p)  bf16  one (Cin_p, Cout_p) slab per tap
    # b_ref: (1, Cout_p)         f32   (zero in padded lanes -> padded outputs stay 0)
    # o_ref: (TH, W, Cout_p)     bf16  one output row tile
    th, w_out, cout_p = o_ref.shape
    cin_p = x_ref.shape[-1]

    r0 = pl.multiple_of(pl.program_id(1) * th, th)   # first padded-input row of the tile

    # Hoist the kx (sublane) shifts out of the tap loop: 3 shifted (TH+2)-row windows
    # (1 aligned + 2 unaligned copies) instead of 9 per-tap unaligned copies.  The ky
    # offsets taken from them below are cheap leading-dim slices.
    wins = [x_ref[pl.ds(r0, th + 2), pl.ds(kx, w_out), :] for kx in range(3)]

    # Accumulate the 9 taps over vreg-sized M sub-chunks so the f32 accumulator does
    # not round-trip VMEM once per tap; initialize it with the broadcast bias instead
    # of zeros + a separate add pass.  (Toy shapes -> single chunk.)
    mchunk = max(1, min(th, _ACC_ROWS // max(1, w_out)))
    for m0 in range(0, th, mchunk):
        mc = min(mchunk, th - m0)
        acc = jnp.broadcast_to(b_ref[...], (mc * w_out, cout_p))   # f32, bias-initialized
        for ky in range(3):
            for kx in range(3):
                # Leading-dim (cheap) slice of the hoisted kx-shifted window.
                patch = wins[kx][m0 + ky:m0 + ky + mc]             # (mc, W, Cin_p)
                # TODO(synk): on v6e/v7x, concatenate the 3 kx windows on the lane axis
                # (K = 3*Cin_p) to fill the 256-deep MXU instead of K = Cin_p matmuls.
                acc = acc + jnp.dot(patch.reshape(mc * w_out, cin_p),
                                    w_ref[ky * 3 + kx],
                                    preferred_element_type=jnp.float32)
        if apply_relu:
            acc = jnp.maximum(acc, 0.0)
        o_ref[pl.ds(m0, mc), :, :] = acc.reshape(mc, w_out, cout_p).astype(o_ref.dtype)


def conv3x3_bias_act(x, w9, b, *, apply_relu, row_tile=8):
    """x: (N, H, W, Cin_p) bf16 NHWC -> (N, H, W, Cout_p) bf16 (Cout_p lane-padded)."""
    n, h, w, cin_p = x.shape
    assert cin_p == w9.shape[1], "input channels must match the prepared weight layout"
    cout_p = w9.shape[-1]
    th = _pick_row_tile(h, row_tile)

    # TODO(synk): fold this spatial zero-pad into the kernel (zeroed VMEM halo or
    # masked boundary taps) to save one activation HBM round trip per layer.
    xp = jnp.pad(x, ((0, 0), (1, 1), (1, 1), (0, 0)))

    flops = 2 * 9 * n * h * w * cin_p * cout_p
    bytes_accessed = (xp.size * xp.dtype.itemsize
                      + w9.size * w9.dtype.itemsize
                      + b.size * b.dtype.itemsize
                      + n * h * w * cout_p * x.dtype.itemsize)

    cp_kwargs = dict(
        # Batch axis "parallel" (megacore / dual-TC sharding); row-tile axis
        # "arbitrary" so a v7x does not duplicate the resident-image DMA per core.
        dimension_semantics=("parallel", "arbitrary"),
    )
    vmem_limit = _pick_vmem_limit()
    if vmem_limit is not None:
        cp_kwargs["vmem_limit_bytes"] = vmem_limit

    kernel = functools.partial(_conv3x3_kernel, apply_relu=apply_relu)
    return pl.pallas_call(
        kernel,
        grid=(n, h // th),
        in_specs=[
            # Full padded image per batch element: block index independent of the
            # row-tile axis -> DMA'd once per image, stays resident in VMEM.
            # TODO(synk): for very large images on v7x (64 MiB VMEM) switch to streamed
            # (TH+2)-row halo tiles via manual DMA (memory_space=pl.ANY).
            pl.BlockSpec((None, h + 2, w + 2, cin_p), lambda bi, ri: (bi, 0, 0, 0)),
            # Weights / bias are grid-invariant: single-buffer to reclaim VMEM headroom.
            pl.BlockSpec((9, cin_p, cout_p), lambda bi, ri: (0, 0, 0),
                         pipeline_mode=pl.Buffered(1)),
            pl.BlockSpec((1, cout_p), lambda bi, ri: (0, 0),
                         pipeline_mode=pl.Buffered(1)),
        ],
        out_specs=pl.BlockSpec((None, th, w, cout_p), lambda bi, ri: (bi, ri, 0, 0)),
        out_shape=jax.ShapeDtypeStruct((n, h, w, cout_p), x.dtype),
        compiler_params=pltpu.CompilerParams(**cp_kwargs),
        cost_estimate=pl.CostEstimate(flops=flops, transcendentals=0,
                                      bytes_accessed=bytes_accessed),
    )(xp, w9, b)


# -----------------------------------------------------------------------------
# Parameter preparation (PyTorch layouts -> lane-padded kernel layouts).
# -----------------------------------------------------------------------------
def fold_bn_eval(weight, bias, gamma, beta, running_mean, running_var, eps=BN_EPS):
    """Fold an eval-mode BatchNorm2d into the preceding Conv2d (frozen perceptual net)."""
    scale = gamma / jnp.sqrt(running_var + eps)               # (Cout,)
    w_f = weight * scale[:, None, None, None]                 # (Cout, Cin, 3, 3)
    b_f = (bias - running_mean) * scale + beta
    return w_f, b_f


def prep_conv_params(weight, bias, *, pad_cin=True):
    """weight: (Cout, Cin, 3, 3), bias: (Cout,)  (PyTorch conventions).

    pad_cin=False is the first-layer specialization: keep the tiny real input channel
    count (e.g. RGB: 3) instead of inflating the input image ~42x to 128 lanes.
    Padded Cout lanes carry zero weights and zero bias, so they stay exactly zero in
    the output and feed zero into the next layer's padded Cin rows (also zero).
    """
    cout, cin = weight.shape[0], weight.shape[1]
    cin_p = _round_up(cin, LANE) if pad_cin else cin
    cout_p = _round_up(cout, LANE)
    w = jnp.transpose(weight, (2, 3, 1, 0)).reshape(9, cin, cout)      # (KH*KW, Cin, Cout)
    w = jnp.pad(w, ((0, 0), (0, cin_p - cin), (0, cout_p - cout))).astype(jnp.bfloat16)
    b = jnp.pad(bias, (0, cout_p - cout)).reshape(1, cout_p).astype(jnp.float32)
    return (w, b, cout, cin_p)


# -----------------------------------------------------------------------------
# _PerceptualNetwork.forward: iterate the Sequential, collect named features.
# Conv+ReLU pairs are fused into one kernel launch unless the conv's own
# (pre-ReLU) output is one of the requested features.
# -----------------------------------------------------------------------------
def perceptual_network_forward(x_nchw, network, layer_name_mapping, layers):
    n, c, h, w = x_nchw.shape
    # Input channel padding is dictated by the first conv layer's (possibly
    # small-Cin-specialized) weight layout.
    first_conv = next((p for k, p in network if k == "conv3x3"), None)
    cin_p = first_conv[3] if first_conv is not None else _round_up(c, LANE)
    assert cin_p >= c
    # NCHW -> NHWC bf16 once, at the network boundary.
    x = jnp.transpose(x_nchw, (0, 2, 3, 1))
    x = jnp.pad(x, ((0, 0), (0, 0), (0, 0), (0, cin_p - c))).astype(jnp.bfloat16)
    c_real = c

    def extract(t, cr):
        return jnp.transpose(t[..., :cr].astype(jnp.float32), (0, 3, 1, 2))  # NCHW

    outputs = {}
    i, n_layers = 0, len(network)
    while i < n_layers:
        kind, params = network[i]
        if kind == "conv3x3":
            w9, b, cout, _ = params
            fuse = (i + 1 < n_layers and network[i + 1][0] == "relu"
                    and layer_name_mapping.get(i) not in layers)
            x = conv3x3_bias_act(x, w9, b, apply_relu=fuse)
            c_real = cout
            if layer_name_mapping.get(i) in layers:          # pre-ReLU conv feature
                outputs[layer_name_mapping[i]] = extract(x, c_real)
            if fuse:
                i += 1                                       # consume the fused ReLU
                if layer_name_mapping.get(i) in layers:
                    outputs[layer_name_mapping[i]] = extract(x, c_real)
            i += 1
            continue
        if kind == "relu":                                   # standalone (unfused) ReLU
            x = jnp.maximum(x, 0)
        elif kind == "maxpool2":
            # TODO(synk): fuse the 2x2 MaxPool2d into the preceding conv kernel's
            # epilogue; it is currently an XLA reshape+max between Pallas calls.
            nb, hh, ww, cc = x.shape
            assert hh % 2 == 0 and ww % 2 == 0, "2x2 maxpool needs even spatial dims"
            x = x.reshape(nb, hh // 2, 2, ww // 2, 2, cc).max(axis=(2, 4))
        else:
            raise ValueError(f"unknown layer kind: {kind}")
        if layer_name_mapping.get(i) in layers:
            outputs[layer_name_mapping[i]] = extract(x, c_real)
        i += 1
    return outputs


# -----------------------------------------------------------------------------
# Pure-JAX (XLA, f32) reference for correctness checking.
# -----------------------------------------------------------------------------
def _ref_conv(x, weight, bias):
    y = lax.conv_general_dilated(x, weight, (1, 1), ((1, 1), (1, 1)),
                                 dimension_numbers=("NCHW", "OIHW", "NCHW"))
    return y + bias[None, :, None, None]


def reference_features(x, w1, b1, w2, b2, w3, b3, gamma, beta, rm, rv):
    out = {}
    h = jnp.maximum(_ref_conv(x, w1, b1), 0.0)
    out["relu_1_1"] = h
    h = jnp.maximum(_ref_conv(h, w2, b2), 0.0)
    n, c, hh, ww = h.shape
    h = h.reshape(n, c, hh // 2, 2, ww // 2, 2).max(axis=(3, 5))
    h = _ref_conv(h, w3, b3)
    scale = gamma / jnp.sqrt(rv + BN_EPS)
    h = (h - rm[None, :, None, None]) * scale[None, :, None, None] + beta[None, :, None, None]
    out["relu_2_1"] = jnp.maximum(h, 0.0)
    return out


if __name__ == "__main__":
    key = jax.random.PRNGKey(0)
    ks = jax.random.split(key, 10)

    N, Cin, H, W = 2, 4, 16, 16
    x = jax.random.normal(ks[0], (N, Cin, H, W), jnp.float32)

    # Frozen feature-extractor parameters (PyTorch layouts).
    w1 = jax.random.normal(ks[1], (8, 4, 3, 3), jnp.float32) * 0.2
    b1 = jax.random.normal(ks[2], (8,), jnp.float32) * 0.1
    w2 = jax.random.normal(ks[3], (8, 8, 3, 3), jnp.float32) * 0.2
    b2 = jax.random.normal(ks[4], (8,), jnp.float32) * 0.1
    w3 = jax.random.normal(ks[5], (16, 8, 3, 3), jnp.float32) * 0.2
    b3 = jax.random.normal(ks[6], (16,), jnp.float32) * 0.1
    # Eval-mode BatchNorm after conv3 (frozen net -> folded into the conv weights).
    gamma = 1.0 + 0.1 * jax.random.normal(ks[7], (16,), jnp.float32)
    beta = 0.1 * jax.random.normal(ks[8], (16,), jnp.float32)
    rm = 0.1 * jax.random.normal(ks[9], (16,), jnp.float32)
    rv = 0.5 + jnp.abs(0.5 * jax.random.normal(ks[9], (16,), jnp.float32))

    w3f, b3f = fold_bn_eval(w3, b3, gamma, beta, rm, rv)

    # The nn.Sequential being wrapped (conv+BN fused as one frozen conv entry).
    network = [
        ("conv3x3", prep_conv_params(w1, b1, pad_cin=False)),  # 0  (small-Cin first layer)
        ("relu", None),                                        # 1  -> relu_1_1
        ("conv3x3", prep_conv_params(w2, b2)),                 # 2
        ("relu", None),                                        # 3  -> relu_1_2
        ("maxpool2", None),                                    # 4
        ("conv3x3", prep_conv_params(w3f, b3f)),               # 5
        ("relu", None),                                        # 6  -> relu_2_1
    ]
    layer_name_mapping = {1: "relu_1_1", 3: "relu_1_2", 6: "relu_2_1"}
    layers = ["relu_1_1", "relu_2_1"]

    feats = perceptual_network_forward(x, network, layer_name_mapping, layers)
    feats = jax.block_until_ready(feats)

    ref = reference_features(x, w1, b1, w2, b2, w3, b3, gamma, beta, rm, rv)

    assert set(feats.keys()) == set(layers)
    assert feats["relu_1_1"].shape == (N, 8, H, W)
    assert feats["relu_2_1"].shape == (N, 16, H // 2, W // 2)
    for name in layers:
        assert bool(jnp.all(feats[name] >= 0.0))                      # ReLU outputs
        assert bool(jnp.allclose(feats[name], ref[name], rtol=5e-2, atol=5e-2)), name

    print("KERNEL_OK")
</pallas_src>

<mosaic_0001>
module attributes {stable_mosaic.version = 11 : i64} {
  func.func @_conv3x3_kernel(%arg0: i32, %arg1: i32, %arg2: memref<1x18x18x4xbf16, #tpu.memory_space<vmem>>, %arg3: memref<9x4x128xbf16, #tpu.memory_space<vmem>>, %arg4: memref<1x128xf32, #tpu.memory_space<vmem>>, %arg5: memref<1x8x16x128xbf16, #tpu.memory_space<vmem>>) attributes {dimension_semantics = [#tpu.dimension_semantics<parallel>, #tpu.dimension_semantics<arbitrary>], iteration_bounds = array<i64: 2, 2>, scalar_prefetch = 0 : i64, scratch_operands = 0 : i64, tpu.core_type = #tpu.core_type<tc>, window_params = [{transform_indices = @transform_0, window_bounds = array<i64: 1, 18, 18, 4>}, {pipeline_mode = #tpu.pipeline_mode<synchronous>, transform_indices = @transform_1, window_bounds = array<i64: 9, 4, 128>}, {pipeline_mode = #tpu.pipeline_mode<synchronous>, transform_indices = @transform_2, window_bounds = array<i64: 1, 128>}, {transform_indices = @transform_3, window_bounds = array<i64: 1, 8, 16, 128>}]} {
    %c8_i32 = arith.constant 8 : i32
    %0 = arith.muli %arg1, %c8_i32 : i32
    %1 = tpu.assume_multiple %0, 8 : i32
    %c0 = arith.constant 0 : index
    %2 = arith.index_cast %1 : i32 to index
    %c0_0 = arith.constant 0 : index
    %c0_1 = arith.constant 0 : index
    %3 = vector.load %arg2[%c0, %2, %c0_0, %c0_1] : memref<1x18x18x4xbf16, #tpu.memory_space<vmem>>, vector<1x10x16x4xbf16>
    %4 = vector.shape_cast %3 : vector<1x10x16x4xbf16> to vector<10x16x4xbf16>
    %c0_2 = arith.constant 0 : index
    %5 = arith.index_cast %1 : i32 to index
    %c1 = arith.constant 1 : index
    %c0_3 = arith.constant 0 : index
    %6 = vector.load %arg2[%c0_2, %5, %c1, %c0_3] : memref<1x18x18x4xbf16, #tpu.memory_space<vmem>>, vector<1x10x16x4xbf16>
    %7 = vector.shape_cast %6 : vector<1x10x16x4xbf16> to vector<10x16x4xbf16>
    %c0_4 = arith.constant 0 : index
    %8 = arith.index_cast %1 : i32 to index
    %c2 = arith.constant 2 : index
    %c0_5 = arith.constant 0 : index
    %9 = vector.load %arg2[%c0_4, %8, %c2, %c0_5] : memref<1x18x18x4xbf16, #tpu.memory_space<vmem>>, vector<1x10x16x4xbf16>
    %10 = vector.shape_cast %9 : vector<1x10x16x4xbf16> to vector<10x16x4xbf16>
    %c0_6 = arith.constant 0 : index
    %c0_7 = arith.constant 0 : index
    %11 = vector.load %arg4[%c0_6, %c0_7] : memref<1x128xf32, #tpu.memory_space<vmem>>, vector<1x128xf32>
    %12 = vector.shape_cast %11 : vector<1x128xf32> to vector<1x128xf32>
    %13 = vector.broadcast %12 : vector<1x128xf32> to vector<128x128xf32>
    %14 = vector.extract_strided_slice %4 {offsets = [0, 0, 0], sizes = [8, 16, 4], strides = [1, 1, 1]} : vector<10x16x4xbf16> to vector<8x16x4xbf16>
    %15 = vector.shape_cast %14 : vector<8x16x4xbf16> to vector<128x4xbf16>
    %c0_8 = arith.constant 0 : index
    %c0_9 = arith.constant 0 : index
    %c0_10 = arith.constant 0 : index
    %16 = vector.load %arg3[%c0_8, %c0_9, %c0_10] : memref<9x4x128xbf16, #tpu.memory_space<vmem>>, vector<1x4x128xbf16>
    %17 = vector.shape_cast %16 : vector<1x4x128xbf16> to vector<4x128xbf16>
    %cst = arith.constant dense<0.000000e+00> : vector<128x128xf32>
    %18 = tpu.matmul %15, %17, %cst {dimension_numbers = #tpu.dot_dimension_numbers<[1], [0], [0], [1], [0, 0, 1, 1], [], []>} : vector<128x4xbf16>, vector<4x128xbf16>, vector<128x128xf32> -> vector<128x128xf32>
    %19 = arith.addf %13, %18 : vector<128x128xf32>
    %20 = vector.extract_strided_slice %7 {offsets = [0, 0, 0], sizes = [8, 16, 4], strides = [1, 1, 1]} : vector<10x16x4xbf16> to vector<8x16x4xbf16>
    %21 = vector.shape_cast %20 : vector<8x16x4xbf16> to vector<128x4xbf16>
    %c1_11 = arith.constant 1 : index
    %c0_12 = arith.constant 0 : index
    %c0_13 = arith.constant 0 : index
    %22 = vector.load %arg3[%c1_11, %c0_12, %c0_13] : memref<9x4x128xbf16, #tpu.memory_space<vmem>>, vector<1x4x128xbf16>
    %23 = vector.shape_cast %22 : vector<1x4x128xbf16> to vector<4x128xbf16>
    %cst_14 = arith.constant dense<0.000000e+00> : vector<128x128xf32>
    %24 = tpu.matmul %21, %23, %cst_14 {dimension_numbers = #tpu.dot_dimension_numbers<[1], [0], [0], [1], [0, 0, 1, 1], [], []>} : vector<128x4xbf16>, vector<4x128xbf16>, vector<128x128xf32> -> vector<128x128xf32>
    %25 = arith.addf %19, %24 : vector<128x128xf32>
    %26 = vector.extract_strided_slice %10 {offsets = [0, 0, 0], sizes = [8, 16, 4], strides = [1, 1, 1]} : vector<10x16x4xbf16> to vector<8x16x4xbf16>
    %27 = vector.shape_cast %26 : vector<8x16x4xbf16> to vector<128x4xbf16>
    %c2_15 = arith.constant 2 : index
    %c0_16 = arith.constant 0 : index
    %c0_17 = arith.constant 0 : index
    %28 = vector.load %arg3[%c2_15, %c0_16, %c0_17] : memref<9x4x128xbf16, #tpu.memory_space<vmem>>, vector<1x4x128xbf16>
    %29 = vector.shape_cast %28 : vector<1x4x128xbf16> to vector<4x128xbf16>
    %cst_18 = arith.constant dense<0.000000e+00> : vector<128x128xf32>
    %30 = tpu.matmul %27, %29, %cst_18 {dimension_numbers = #tpu.dot_dimension_numbers<[1], [0], [0], [1], [0, 0, 1, 1], [], []>} : vector<128x4xbf16>, vector<4x128xbf16>, vector<128x128xf32> -> vector<128x128xf32>
    %31 = arith.addf %25, %30 : vector<128x128xf32>
    %32 = vector.extract_strided_slice %4 {offsets = [1, 0, 0], sizes = [8, 16, 4], strides = [1, 1, 1]} : vector<10x16x4xbf16> to vector<8x16x4xbf16>
    %33 = vector.shape_cast %32 : vector<8x16x4xbf16> to vector<128x4xbf16>
    %c3 = arith.constant 3 : index
    %c0_19 = arith.constant 0 : index
    %c0_20 = arith.constant 0 : index
    %34 = vector.load %arg3[%c3, %c0_19, %c0_20] : memref<9x4x128xbf16, #tpu.memory_space<vmem>>, vector<1x4x128xbf16>
    %35 = vector.shape_cast %34 : vector<1x4x128xbf16> to vector<4x128xbf16>
    %cst_21 = arith.constant dense<0.000000e+00> : vector<128x128xf32>
    %36 = tpu.matmul %33, %35, %cst_21 {dimension_numbers = #tpu.dot_dimension_numbers<[1], [0], [0], [1], [0, 0, 1, 1], [], []>} : vector<128x4xbf16>, vector<4x128xbf16>, vector<128x128xf32> -> vector<128x128xf32>
    %37 = arith.addf %31, %36 : vector<128x128xf32>
    %38 = vector.extract_strided_slice %7 {offsets = [1, 0, 0], sizes = [8, 16, 4], strides = [1, 1, 1]} : vector<10x16x4xbf16> to vector<8x16x4xbf16>
    %39 = vector.shape_cast %38 : vector<8x16x4xbf16> to vector<128x4xbf16>
    %c4 = arith.constant 4 : index
    %c0_22 = arith.constant 0 : index
    %c0_23 = arith.constant 0 : index
    %40 = vector.load %arg3[%c4, %c0_22, %c0_23] : memref<9x4x128xbf16, #tpu.memory_space<vmem>>, vector<1x4x128xbf16>
    %41 = vector.shape_cast %40 : vector<1x4x128xbf16> to vector<4x128xbf16>
    %cst_24 = arith.constant dense<0.000000e+00> : vector<128x128xf32>
    %42 = tpu.matmul %39, %41, %cst_24 {dimension_numbers = #tpu.dot_dimension_numbers<[1], [0], [0], [1], [0, 0, 1, 1], [], []>} : vector<128x4xbf16>, vector<4x128xbf16>, vector<128x128xf32> -> vector<128x128xf32>
    %43 = arith.addf %37, %42 : vector<128x128xf32>
    %44 = vector.extract_strided_slice %10 {offsets = [1, 0, 0], sizes = [8, 16, 4], strides = [1, 1, 1]} : vector<10x16x4xbf16> to vector<8x16x4xbf16>
    %45 = vector.shape_cast %44 : vector<8x16x4xbf16> to vector<128x4xbf16>
    %c5 = arith.constant 5 : index
    %c0_25 = arith.constant 0 : index
    %c0_26 = arith.constant 0 : index
    %46 = vector.load %arg3[%c5, %c0_25, %c0_26] : memref<9x4x128xbf16, #tpu.memory_space<vmem>>, vector<1x4x128xbf16>
    %47 = vector.shape_cast %46 : vector<1x4x128xbf16> to vector<4x128xbf16>
    %cst_27 = arith.constant dense<0.000000e+00> : vector<128x128xf32>
    %48 = tpu.matmul %45, %47, %cst_27 {dimension_numbers = #tpu.dot_dimension_numbers<[1], [0], [0], [1], [0, 0, 1, 1], [], []>} : vector<128x4xbf16>, vector<4x128xbf16>, vector<128x128xf32> -> vector<128x128xf32>
    %49 = arith.addf %43, %48 : vector<128x128xf32>
    %50 = vector.extract_strided_slice %4 {offsets = [2, 0, 0], sizes = [8, 16, 4], strides = [1, 1, 1]} : vector<10x16x4xbf16> to vector<8x16x4xbf16>
    %51 = vector.shape_cast %50 : vector<8x16x4xbf16> to vector<128x4xbf16>
    %c6 = arith.constant 6 : index
    %c0_28 = arith.constant 0 : index
    %c0_29 = arith.constant 0 : index
    %52 = vector.load %arg3[%c6, %c0_28, %c0_29] : memref<9x4x128xbf16, #tpu.memory_space<vmem>>, vector<1x4x128xbf16>
    %53 = vector.shape_cast %52 : vector<1x4x128xbf16> to vector<4x128xbf16>
    %cst_30 = arith.constant dense<0.000000e+00> : vector<128x128xf32>
    %54 = tpu.matmul %51, %53, %cst_30 {dimension_numbers = #tpu.dot_dimension_numbers<[1], [0], [0], [1], [0, 0, 1, 1], [], []>} : vector<128x4xbf16>, vector<4x128xbf16>, vector<128x128xf32> -> vector<128x128xf32>
    %55 = arith.addf %49, %54 : vector<128x128xf32>
    %56 = vector.extract_strided_slice %7 {offsets = [2, 0, 0], sizes = [8, 16, 4], strides = [1, 1, 1]} : vector<10x16x4xbf16> to vector<8x16x4xbf16>
    %57 = vector.shape_cast %56 : vector<8x16x4xbf16> to vector<128x4xbf16>
    %c7 = arith.constant 7 : index
    %c0_31 = arith.constant 0 : index
    %c0_32 = arith.constant 0 : index
    %58 = vector.load %arg3[%c7, %c0_31, %c0_32] : memref<9x4x128xbf16, #tpu.memory_space<vmem>>, vector<1x4x128xbf16>
    %59 = vector.shape_cast %58 : vector<1x4x128xbf16> to vector<4x128xbf16>
    %cst_33 = arith.constant dense<0.000000e+00> : vector<128x128xf32>
    %60 = tpu.matmul %57, %59, %cst_33 {dimension_numbers = #tpu.dot_dimension_numbers<[1], [0], [0], [1], [0, 0, 1, 1], [], []>} : vector<128x4xbf16>, vector<4x128xbf16>, vector<128x128xf32> -> vector<128x128xf32>
    %61 = arith.addf %55, %60 : vector<128x128xf32>
    %62 = vector.extract_strided_slice %10 {offsets = [2, 0, 0], sizes = [8, 16, 4], strides = [1, 1, 1]} : vector<10x16x4xbf16> to vector<8x16x4xbf16>
    %63 = vector.shape_cast %62 : vector<8x16x4xbf16> to vector<128x4xbf16>
    %c8 = arith.constant 8 : index
    %c0_34 = arith.constant 0 : index
    %c0_35 = arith.constant 0 : index
    %64 = vector.load %arg3[%c8, %c0_34, %c0_35] : memref<9x4x128xbf16, #tpu.memory_space<vmem>>, vector<1x4x128xbf16>
    %65 = vector.shape_cast %64 : vector<1x4x128xbf16> to vector<4x128xbf16>
    %cst_36 = arith.constant dense<0.000000e+00> : vector<128x128xf32>
    %66 = tpu.matmul %63, %65, %cst_36 {dimension_numbers = #tpu.dot_dimension_numbers<[1], [0], [0], [1], [0, 0, 1, 1], [], []>} : vector<128x4xbf16>, vector<4x128xbf16>, vector<128x128xf32> -> vector<128x128xf32>
    %67 = arith.addf %61, %66 : vector<128x128xf32>
    %cst_37 = arith.constant 0.000000e+00 : f32
    %68 = vector.broadcast %cst_37 : f32 to vector<128x128xf32>
    %69 = arith.maximumf %67, %68 : vector<128x128xf32>
    %70 = vector.shape_cast %69 : vector<128x128xf32> to vector<8x16x128xf32>
    %71 = arith.truncf %70 : vector<8x16x128xf32> to vector<8x16x128xbf16>
    %c0_38 = arith.constant 0 : index
    %c0_39 = arith.constant 0 : index
    %c0_40 = arith.constant 0 : index
    %c0_41 = arith.constant 0 : index
    %72 = vector.load %arg5[%c0_38, %c0_39, %c0_40, %c0_41] : memref<1x8x16x128xbf16, #tpu.memory_space<vmem>>, vector<1x8x16x128xbf16>
    %73 = vector.shape_cast %72 : vector<1x8x16x128xbf16> to vector<8x16x128xbf16>
    %74 = vector.shape_cast %71 : vector<8x16x128xbf16> to vector<1x8x16x128xbf16>
    tpu.vector_store %arg5[%c0_38, %c0_39, %c0_40, %c0_41], %74 {strides = array<i32>} : memref<1x8x16x128xbf16, #tpu.memory_space<vmem>>, vector<1x8x16x128xbf16>,
    return
  }
  func.func @transform_0(%arg0: i32, %arg1: i32) -> (i32, i32, i32, i32) {
    %c0_i32 = arith.constant 0 : i32
    %c0_i32_0 = arith.constant 0 : i32
    %c0_i32_1 = arith.constant 0 : i32
    %c0_i32_2 = arith.constant 0 : i32
    return %arg0, %c0_i32, %c0_i32_0, %c0_i32_1 : i32, i32, i32, i32
  }
  func.func @transform_1(%arg0: i32, %arg1: i32) -> (i32, i32, i32) {
    %c0_i32 = arith.constant 0 : i32
    %c0_i32_0 = arith.constant 0 : i32
    %c0_i32_1 = arith.constant 0 : i32
    %c0_i32_2 = arith.constant 0 : i32
    return %c0_i32, %c0_i32_0, %c0_i32_1 : i32, i32, i32
  }
  func.func @transform_2(%arg0: i32, %arg1: i32) -> (i32, i32) {
    %c0_i32 = arith.constant 0 : i32
    %c0_i32_0 = arith.constant 0 : i32
    %c0_i32_1 = arith.constant 0 : i32
    return %c0_i32, %c0_i32_0 : i32, i32
  }
  func.func @transform_3(%arg0: i32, %arg1: i32) -> (i32, i32, i32, i32) {
    %c0_i32 = arith.constant 0 : i32
    %c0_i32_0 = arith.constant 0 : i32
    %c0_i32_1 = arith.constant 0 : i32
    return %arg0, %arg1, %c0_i32, %c0_i32_0 : i32, i32, i32, i32
  }
}

</mosaic_0001>

<bundles_post_ra>
// kernel: tpu_custom_call.1
= control target key start
LH: loop header
LB: loop body
LE: loop exit
PB: predicated region body
PF: predicated region fallthrough
CT: control target
= control target key end

     0   :  { %8 = vsyncpa [#allocation3], 0  ;;  %s2601_s0 = inlined_call_operand.vmem [shape: bf16[2,18,18,4], index: 0, kind: input, shape index: {}]   ;;  %s2602_s1 = inlined_call_operand.vmem [shape: bf16[9,4,128], index: 1, kind: input, shape index: {}]   ;;  %s2603_s2 = inlined_call_operand.vmem [shape: f32[1,128], index: 2, kind: input, shape index: {}]   ;;  %s2604_s3 = inlined_call_operand.hbm [shape: bf16[2,16,16,128], index: 3, kind: output, shape index: {}]  }
   0x1   :  { %10 = vsyncpa [#allocation3 + $0x1], 0  ;;  %s1947_s12 = smov 0   ;;  %s1949_s13 = smov 0  }
   0x2   :  { %s1951_s14 = smov 0   ;;  %s1953_s15 = smov 0  }
   0x3   :  { %s1955_s16 = smov 0   ;;  %s1957_s17 = smov 0  }
   0x4   :  { %s1959_s18 = smov 0   ;;  %s1961_s19 = smov 0  }
   0x5 LB: > { %s1545_s20 = sadd.s32 4294967295, %s1923_s19   ;;  %s1546_s21 = sadd.s32 4294967294, %s1923_s19   ;;  %s1923_s19 = sphi %s1961_s19, %s16_s19   ;;  %s1919_s18 = sphi %s1959_s18, %s2617_s18   ;;  %s1915_s17 = sphi %s1957_s17, %s2616_s17   ;;  %s1911_s16 = sphi %s1955_s16, %s2615_s16   ;;  %s1907_s15 = sphi %s1953_s15, %s2614_s15   ;;  %s1903_s14 = sphi %s1951_s14, %s2613_s14   ;;  %s1899_s13 = sphi %s1949_s13, %s2612_s13   ;;  %s1895_s12 = sphi %s1947_s12, %s2611_s12  }
   0x6   : > { %s25_s22 = sadd.s32 1, %s1915_s17  ;;  %s28_s23 = sadd.s32 1, %s1919_s18 }
   0x7   : > { %p26_p0 = scmp.ge.s32.totalorder %s25_s22, 2  ;;  %p115_p1 = scmp.ne.s32.totalorder %s1903_s14, %s1899_s13 }
   0x8   : > { %p116_p2 = scmp.eq.s32.totalorder %s1545_s20, 3  ;;  %p121_p5 = scmp.ne.s32.totalorder %s1899_s13, %s1895_s12 }
   0x9   : > { %s2619_s22 = smov (%p26_p0, %s25_s22), 0  ;;  %s2621_s23 = smov (!%p26_p0, %s28_s23), %s1919_s18 }
   0xa   : > { %s101_s24 = ssub.s32 %s1915_s17, %s2619_s22  ;;  %p1998_p3 = por %p116_p2, %p115_p1 }
   0xb   : > { %p30_p4 = scmp.ge.s32.totalorder %s2621_s23, 2  ;;  %p122_p6 = scmp.eq.s32.totalorder %s1546_s21, 3 }
   0xc   : > { %p1549_p7 = scmp.ge.s32.totalorder %s1923_s19, 1  ;;  %p154_p9 = scmp.lt.s32.totalorder %s1923_s19, 5 }
   0xd   : > { %s2623_s23 = smov (%p30_p4, %s2621_s23), 0  ;;  %p2007_p8 = por %p122_p6, %p121_p5 }
   0xe   : > { %s100_s27 = ssub.s32 %s1919_s18, %s2623_s23  ;;  %s105_s28 = sadd.s32 1, %s1903_s14 }
   0xf   : > { %s102_s29 = sor.u32 %s101_s24, %s100_s27  ;;  %p155_p10 = pnand %p1549_p7, %p154_p9 }
  0x10   : > { %p103_p11 = scmp.eq.s32.totalorder %s102_s29, 0  ;;  %p178_p12 = scmp.lt.s32.totalorder (!%p155_p10), %s1911_s16, 1 }
  0x11   : > { %158 = sbr.rel (%p155_p10) target bundleno = 456 (0x1c8), region = 32  ;;  %s175_s29 = sand.u32 (!%p155_p10), 1, %s1899_s13  }
  0x12   : > { %s2016_s30 = scalar_select %p103_p11, %s1903_s14, %s105_s28  }
  0x13   : > { %s1692_s21 = smul.u32 (!%p155_p10), 96, %s1907_s15  ;;  %s1550_s4 = sshll.u32 (!%p155_p10), %s175_s29, 6 }
  0x14   : > { %s1688_s7 = sshll.u32 (!%p155_p10), %s1911_s16, 5 }
  0x16   : > { %v233_v0 = vld [vmem:[%s2602_s1] sm:$0x3]  ;;  %vm299_vm0 = vcmask 1041408   ;;  %v1612_v2 = vld [vmem:[%s2602_s1 + $0x4] sm:$0x3]  ;;  %s179_s10 = scalar_select %p178_p12, %s1911_s16, 1 }
  0x17   : > { %v301_v1 = vsel %vm299_vm0, %v233_v0, 0  ;;  %v1621_v3 = vld [vmem:[%s2602_s1 + $0x6] sm:$0x3]  ;;  %v807_v4 = vsel %vm299_vm0, %v1612_v2, 0  ;;  %v1595_v6 = vld [vmem:[%s2602_s1 + $0x2] sm:$0x3] }
  0x18   : > { %1751 = vmatpush.bf16.msra.mxu1 %v301_v1  ;;  %1752 = vmatpush.bf16.msra.mxu2 %v301_v1  ;;  %v885_v5 = vsel %vm299_vm0, %v1621_v3, 0  ;;  %v614_v7 = vsel %vm299_vm0, %v1595_v6, 0  ;;  %v1634_v8 = vld [vmem:[%s2602_s1 + $0x8] sm:$0x3]  ;;  %s1754_s28 = smul.u32 216, %s179_s10  ;;  %vm274_vm1 = vcmask 31744  }
  0x19   : > { %1753 = vmatpush.bf16.msra.mxu3 %v301_v1  ;;  %310 = vmatpush.bf16.msra.mxu0 %v301_v1  ;;  %v985_v9 = vsel %vm299_vm0, %v1634_v8, 0  ;;  %v1653_v16 = vld [vmem:[%s2602_s1 + $0xc] sm:$0x3]  ;;  %v1666_v26 = vld [vmem:[%s2602_s1 + $0xe] sm:$0x3]  ;;  %vm697_vm2 = vcmask 1042432  }
  0x1a   : > { %s182_s5 = scalar_lea.vmem %s2601_s0, %s1754_s28  ;;  %v1148_v22 = vsel %vm299_vm0, %v1653_v16, 0  ;;  %v1644_v30 = vld [vmem:[%s2602_s1 + $0xa] sm:$0x3]  ;;  %v1676_v31 = vld [vmem:[%s2602_s1 + $0x10] sm:$0x3]  ;;  %v1248_v35 = vsel %vm299_vm0, %v1666_v26, 0 }
  0x1b   : > { %s2044_s6 = scalar_lea.vmem %s182_s5, %s1692_s21  ;;  %v1070_v42 = vsel %vm299_vm0, %v1644_v30, 0  ;;  %v1333_v43 = vsel %vm299_vm0, %v1676_v31, 0  ;;  %vm698_vm3 = vcmask 1046532   ;;  %vm368_vm4 = vsmask.f32 3328  ;;  %s2532_s5 = scalar_lea.vmem [#allocation2], %s1550_s4 }
  0x1c   : > { %816 = vmatpush.bf16.msrb.mxu2 %v807_v4  ;;  %623 = vmatpush.bf16.msrb.mxu1 %v614_v7  ;;  %v2047_v10 = vld [vmem:[%s2044_s6 + $0x18] sm:$0xff]  ;;  %v2050_v11 = vld [vmem:[%s2044_s6 + $0x30] sm:$0xff]  ;;  %v2053_v12 = vld [vmem:[%s2044_s6 + $0x48] sm:$0xff]  ;;  %vm369_vm5 = vsmask.f32 7440  ;;  %s1464_s16 = sshll.u32 %s2532_s5, 4  ;;  %s1465_s16 = int_to_ptr.vmem [resolvable:$true] %s1464_s16 }
  0x1d   : > { %894 = vmatpush.bf16.msrb.mxu3 %v885_v5  ;;  %994 = vmatpush.bf16.msrb.mxu0 %v985_v9  ;;  %v1693_v13 = vld [vmem:[%s2044_s6] sm:$0xff]  ;;  %v191_v18 = vld [vmem:[%s2044_s6 + $0xc] sm:$0xf]  ;;  %v2075_v23 = vld [vmem:[%s2044_s6 + $0x10] sm:$0xf]  ;;  %s1449_s21 = scalar_lea.sflag [#allocation3], %s175_s29 }
  0x1e   : > { %1589 = vmatmul.msk.bf16.vlgmr.msra.gmra.mxu1 %vm274_vm1, %v2047_v10  ;;  %1591 = vmatmul.msk.bf16.vlgmr.msra.gmra.mxu2 %vm274_vm1, %v2050_v11  ;;  %v189_v14 = vld [vmem:[%s2044_s6] sm:$0xf]  ;;  %v2065_v15 = vld [vmem:[%s2044_s6 + $0x4] sm:$0xf]  ;;  %v396_v24 = vshrl.u32 %v191_v18, 16  ;;  %v399_v25 = vshll.u32 %v191_v18, 16  ;;  %vm2120_vm6 = vmor %vm697_vm2, %vm698_vm3 }
  0x1f   : > { %1593 = vmatmul.msk.bf16.vlgmr.msra.gmra.mxu3 %vm274_vm1, %v2053_v12  ;;  %1587 = vmatmul.msk.bf16.vlgmr.msra.gmra.mxu0 %vm274_vm1, %v1693_v13  ;;  %v372_v17 = vshrl.u32 %v189_v14, 16  ;;  %v375_v19 = vshll.u32 %v189_v14, 16  ;;  %v381_v20 = vshll.u32 %v2065_v15, 16  ;;  %v385_v21 = vshrl.u32 %v2065_v15, 16  ;;  %v209_v36 = vld [vmem:[%s2044_s6 + $0x8] sm:$0x1]  ;;  %vm2124_vm7 = vmor %vm368_vm4, %vm369_vm5 }
  0x20   : > { %1157 = vmatpush.bf16.msra.mxu2 %v1148_v22  ;;  %v405_v27 = vshll.u32 %v2075_v23, 16  ;;  %v409_v29 = vshrl.u32 %v2075_v23, 16  ;;  %v398_v37 = vrot.slane %v396_v24, 4  ;;  %v401_v38 = vrot.slane %v399_v25, 5  ;;  %v2091_v41 = vld [vmem:[%s2044_s6 + $0x14] sm:$0x1]  ;;  %1079 = vmatpush.bf16.msra.mxu1 %v1070_v42 }
  0x21   : > { %v374_v28 = vrot.slane %v372_v17, 4  ;;  %v377_v32 = vrot.slane %v375_v19, 5  ;;  %v383_v33 = vrot.slane %v381_v20, 5  ;;  %v387_v34 = vrot.slane %v385_v21, 4  ;;  %1257 = vmatpush.bf16.msra.mxu3 %v1248_v35  ;;  %v2096_v44 = vld [vmem:[%s2044_s6 + $0x24] sm:$0xff]  ;;  %v2099_v45 = vld [vmem:[%s2044_s6 + $0x3c] sm:$0xff]  ;;  %1342 = vmatpush.bf16.msra.mxu0 %v1333_v43 }
  0x22   : > { %v407_v39 = vrot.slane %v405_v27, 5  ;;  %v411_v40 = vrot.slane %v409_v29, 4  ;;  %v702_v46 = vrot.slane %v2065_v15, 5  ;;  %v2103_v47 = vld [vmem:[%s2044_s6 + $0x54] sm:$0xff]  ;;  %v2106_v48 = vld [vmem:[%s2044_s6 + $0xc] sm:$0xff]  ;;  %v391_v51 = vshll.u32 %v209_v36, 16 }
  0x23   : > { %v378_v49 = vor.u32 %v377_v32, %v374_v28  ;;  %v388_v50 = vor.u32 %v387_v34, %v383_v33  ;;  %v219_v52 = vld [vmem:[%s2044_s6] sm:$0xe]  ;;  %v402_v53 = vor.u32 %v401_v38, %v398_v37  ;;  %v415_v55 = vshll.u32 %v2091_v41, 16  ;;  %v193_v3 = vld [vmem:[%s2044_s6 + $0x18] sm:$0xf] }
  0x24   : > { %v412_v54 = vor.u32 %v411_v40, %v407_v39  ;;  %v1604_v56 = vrot.slane %v219_v52, 9  ;;  %v704_v57 = vrot.slane %v702_v46, 4  ;;  %v705_v58 = vrot.slane %v209_v36, 5  ;;  %v2130_v4 = vld [vmem:[%s2044_s6 + $0x1c] sm:$0xf] }
  0x25   : > { %v379_v59 = vrot.slane %v378_v49, 4  ;;  %v389_v60 = vrot.slane %v388_v50, 4  ;;  %v393_v61 = vrot.slane %v391_v51, 5  ;;  %v403_v0 = vrot.slane %v402_v53, 4  ;;  %v211_v30 = vld [vmem:[%s2044_s6 + $0x20] sm:$0x1] }
  0x26   : > { %v413_v1 = vrot.slane %v412_v54, 4  ;;  %v417_v2 = vrot.slane %v415_v55, 5  ;;  %v703_v5 = vsel %vm2120_vm6, %v1604_v56, %v702_v46  ;;  %v706_v6 = vsel %vm2120_vm6, %v704_v57, %v705_v58  ;;  %v2157_v42 = vld [vmem:[%s2044_s6 + $0x28] sm:$0xf] }
  0x27   : > { %v384_v7 = vsel %vm2124_vm7, %v379_v59, %v383_v33  ;;  %v394_v8 = vsel %vm2124_vm7, %v389_v60, %v393_v61  ;;  %v420_v9 = vshrl.u32 %v193_v3, 16  ;;  %v423_v13 = vshll.u32 %v193_v3, 16  ;;  %v220_v33 = vld [vmem:[%s2044_s6 + $0xc] sm:$0xe] }
  0x28   : > { %v408_v14 = vsel %vm2124_vm7, %v403_v0, %v407_v39  ;;  %v418_v15 = vsel %vm2124_vm7, %v413_v1, %v417_v2  ;;  %v429_v16 = vshll.u32 %v2130_v4, 16  ;;  %v433_v17 = vshrl.u32 %v2130_v4, 16  ;;  %v212_v2 = vld [vmem:[%s2044_s6 + $0x2c] sm:$0x1] }
  0x29   : > { %v565_v18 = vunpack.c.l.b16 %v384_v7  ;;  %v566_v19 = vunpack.c.l.b16 %v394_v8  ;;  %v758_v20 = vunpack.c.l.b16 %v703_v5  ;;  %v759_v21 = vunpack.c.l.b16 %v706_v6  ;;  %v221_v6 = vld [vmem:[%s2044_s6 + $0x18] sm:$0xe] }
  0x2a   : > { %v567_v22 = vunpack.c.l.b16 %v408_v14  ;;  %v568_v24 = vunpack.c.l.b16 %v418_v15  ;;  %v422_v25 = vrot.slane %v420_v9, 4  ;;  %v425_v26 = vrot.slane %v423_v13, 5 }
  0x2b   : > { %v431_v27 = vrot.slane %v429_v16, 5  ;;  %v435_v28 = vrot.slane %v433_v17, 4  ;;  %v709_v29 = vrot.slane %v2075_v23, 5  ;;  %v581_v31 = vpack.c.b16 %v566_v19, %v565_v18  ;;  %v195_v23 = vld [vmem:[%s2044_s6 + $0x24] sm:$0xf] }
  0x2c   : > { %v774_v32 = vpack.c.b16 %v759_v21, %v758_v20  ;;  %v582_v34 = vpack.c.b16 %v568_v24, %v567_v22  ;;  %v426_v35 = vor.u32 %v425_v26, %v422_v25  ;;  %v439_v37 = vshll.u32 %v211_v30, 16  ;;  %v197_v19 = vld [vmem:[%s2044_s6 + $0x30] sm:$0xf]  ;;  %v2185_v20 = vld [vmem:[%s2044_s6 + $0x34] sm:$0xf] }
  0x2d   : > { %v436_v36 = vor.u32 %v435_v28, %v431_v27  ;;  %v1605_v38 = vrot.slane %v220_v33, 9  ;;  %v711_v39 = vrot.slane %v709_v29, 4  ;;  %v712_v40 = vrot.slane %v2091_v41, 5 }
  0x2e   : > { %1590 = vmatmul.msk.bf16.gmra.mxu1 %vm274_vm1, %v2096_v44  ;;  %1592 = vmatmul.msk.bf16.gmra.mxu2 %vm274_vm1, %v2099_v45  ;;  %v427_v43 = vrot.slane %v426_v35, 4  ;;  %v441_v49 = vrot.slane %v439_v37, 5  ;;  %v444_v51 = vshrl.u32 %v195_v23, 16  ;;  %v447_v52 = vshll.u32 %v195_v23, 16 }
  0x2f   : > { %1594 = vmatmul.msk.bf16.gmra.mxu3 %vm274_vm1, %v2103_v47  ;;  %1588 = vmatmul.msk.bf16.gmra.mxu0 %vm274_vm1, %v2106_v48  ;;  %v437_v46 = vrot.slane %v436_v36, 4  ;;  %v710_v50 = vsel %vm2120_vm6, %v1605_v38, %v709_v29  ;;  %v713_v41 = vsel %vm2120_vm6, %v711_v39, %v712_v40  ;;  %v457_v53 = vshrl.u32 %v2157_v42, 16  ;;  %v213_v38 = vld [vmem:[%s2044_s6 + $0x38] sm:$0x1] }
  0x30   : > { %v432_v54 = vsel %vm2124_vm7, %v427_v43, %v431_v27  ;;  %v760_v56 = vunpack.c.l.b16 %v710_v50  ;;  %v761_v57 = vunpack.c.l.b16 %v713_v41  ;;  %v446_v58 = vrot.slane %v444_v51, 4  ;;  %v222_v43 = vld [vmem:[%s2044_s6 + $0x24] sm:$0xe] }
  0x31   : > { %v442_v55 = vsel %vm2124_vm7, %v437_v46, %v441_v49  ;;  %v449_v59 = vrot.slane %v447_v52, 5  ;;  %v459_v61 = vrot.slane %v457_v53, 4  ;;  %v569_v0 = vunpack.c.l.b16 %v432_v54  ;;  %v199_v54 = vld [vmem:[%s2044_s6 + $0x3c] sm:$0xf] }
  0x32   : > { %v570_v1 = vunpack.c.l.b16 %v442_v55  ;;  %v716_v3 = vrot.slane %v2130_v4, 5  ;;  %v2171_v5 = vpack.c.b16 %v761_v57, %v760_v56  ;;  %v463_v9 = vshll.u32 %v212_v2, 16  ;;  %v2214_v55 = vld [vmem:[%s2044_s6 + $0x40] sm:$0xf] }
  0x33   : > { %v450_v7 = vor.u32 %v449_v59, %v446_v58  ;;  %v1606_v14 = vrot.slane %v221_v6, 9  ;;  %v719_v16 = vrot.slane %v211_v30, 5  ;;  %v468_v26 = vshrl.u32 %v197_v19, 16 }
  0x34   : > { %v2174_v13 = vpack.c.b16 %v570_v1, %v569_v0  ;;  %v718_v15 = vrot.slane %v716_v3, 4  ;;  %v465_v18 = vrot.slane %v463_v9, 5  ;;  %v471_v27 = vshll.u32 %v197_v19, 16 }
  0x35   : > { %v451_v17 = vrot.slane %v450_v7, 4  ;;  %v717_v21 = vsel %vm2120_vm6, %v1606_v14, %v716_v3  ;;  %v477_v28 = vshll.u32 %v2185_v20, 16  ;;  %v481_v29 = vshrl.u32 %v2185_v20, 16 }
  0x36   : > { %v720_v22 = vsel %vm2120_vm6, %v718_v15, %v719_v16  ;;  %v762_v30 = vunpack.c.l.b16 %v717_v21  ;;  %v473_v35 = vrot.slane %v471_v27, 5  ;;  %v723_v40 = vrot.slane %v2157_v42, 5 }
  0x37   : > { %v479_v36 = vrot.slane %v477_v28, 5  ;;  %v483_v37 = vrot.slane %v481_v29, 4  ;;  %v487_v50 = vshll.u32 %v213_v38, 16  ;;  %v1607_v41 = vrot.slane %v222_v43, 9  ;;  %v2243_v28 = vld [vmem:[%s2044_s6 + $0x4c] sm:$0xf] }
  0x38   : > { %v725_v51 = vrot.slane %v723_v40, 4  ;;  %v501_v0 = vshll.u32 %v2214_v55, 16  ;;  %v505_v1 = vshrl.u32 %v2214_v55, 16  ;;  %v730_v16 = vrot.slane %v2185_v20, 5  ;;  %v201_v20 = vld [vmem:[%s2044_s6 + $0x48] sm:$0xf] }
  0x39   : > { %v484_v49 = vor.u32 %v483_v37, %v479_v36  ;;  %v489_v53 = vrot.slane %v487_v50, 5  ;;  %v724_v56 = vsel %vm2120_vm6, %v1607_v41, %v723_v40  ;;  %v733_v27 = vrot.slane %v213_v38, 5 }
  0x3a   : > { %v503_v14 = vrot.slane %v501_v0, 5  ;;  %v507_v15 = vrot.slane %v505_v1, 4  ;;  %v529_v37 = vshrl.u32 %v2243_v28, 16 }
  0x3e   : > { %1596 = vmatmul.msk.bf16.vlgmr.msrb.gmra.mxu1 %vm274_vm1, %v581_v31  ;;  %1613 = vmatmul.msk.bf16.vlgmr.msrb.gmra.mxu2 %vm274_vm1, %v774_v32  ;;  %v763_v31 = vunpack.c.l.b16 %v720_v22  ;;  %v508_v22 = vor.u32 %v507_v15, %v503_v14 }
  0x3f   : > { %1626 = vmatmul.msk.bf16.vlgmr.msrb.gmra.mxu3 %vm274_vm1, %v2106_v48  ;;  %1635 = vmatmul.msk.bf16.vlgmr.msrb.gmra.mxu0 %vm274_vm1, %v582_v34  ;;  %v453_v48 = vshll.u32 %v2157_v42, 16  ;;  %v726_v42 = vrot.slane %v212_v2, 5  ;;  %v764_v2 = vunpack.c.l.b16 %v724_v56  ;;  %v224_v56 = vld [vmem:[%s2044_s6 + $0x3c] sm:$0xe] }
  0x40   : > { %v2198_v39 = vpack.c.b16 %v763_v31, %v762_v30  ;;  %v509_v30 = vrot.slane %v508_v22, 4 }
  0x41   : > { %v455_v60 = vrot.slane %v453_v48, 5  ;;  %v485_v48 = vrot.slane %v484_v49, 4  ;;  %v727_v57 = vsel %vm2120_vm6, %v725_v51, %v726_v42  ;;  %v531_v51 = vrot.slane %v529_v37, 4 }
  0x42   : > { %v765_v3 = vunpack.c.l.b16 %v727_v57 }
  0x43   : > { %v460_v8 = vor.u32 %v459_v61, %v455_v60  ;;  %v456_v24 = vsel %vm2124_vm7, %v451_v17, %v455_v60  ;;  %v490_v59 = vsel %vm2124_vm7, %v485_v48, %v489_v53  ;;  %v492_v60 = vshrl.u32 %v199_v54, 16  ;;  %v214_v17 = vld [vmem:[%s2044_s6 + $0x44] sm:$0x1]  ;;  %v215_v48 = vld [vmem:[%s2044_s6 + $0x50] sm:$0x1] }
  0x44   : > { %v571_v32 = vunpack.c.l.b16 %v456_v24  ;;  %v495_v61 = vshll.u32 %v199_v54, 16  ;;  %v574_v7 = vunpack.c.l.b16 %v490_v59  ;;  %v511_v24 = vshll.u32 %v214_v17, 16 }
  0x45   : > { %v461_v4 = vrot.slane %v460_v8, 4  ;;  %v494_v8 = vrot.slane %v492_v60, 4  ;;  %v737_v53 = vrot.slane %v2214_v55, 5  ;;  %v535_v59 = vshll.u32 %v215_v48, 16 }
  0x46   : > { %v497_v9 = vrot.slane %v495_v61, 5  ;;  %v513_v31 = vrot.slane %v511_v24, 5  ;;  %v1609_v61 = vrot.slane %v224_v56, 9  ;;  %v740_v1 = vrot.slane %v214_v17, 5 }
  0x47   : > { %v466_v25 = vsel %vm2124_vm7, %v461_v4, %v465_v18  ;;  %v2228_v4 = vpack.c.b16 %v765_v3, %v764_v2  ;;  %v223_v18 = vld [vmem:[%s2044_s6 + $0x30] sm:$0xe]  ;;  %v739_v0 = vrot.slane %v737_v53, 4  ;;  %v537_v3 = vrot.slane %v535_v59, 5 }
  0x48   : > { %v572_v33 = vunpack.c.l.b16 %v466_v25  ;;  %v498_v21 = vor.u32 %v497_v9, %v494_v8  ;;  %v1608_v25 = vrot.slane %v223_v18, 9  ;;  %v514_v40 = vsel %vm2124_vm7, %v509_v30, %v513_v31  ;;  %v2285_v31 = vld [vmem:[%s2044_s6 + $0x5c] sm:$0x1] }
  0x49   : > { %v738_v8 = vsel %vm2120_vm6, %v1609_v61, %v737_v53  ;;  %v741_v9 = vsel %vm2120_vm6, %v739_v0, %v740_v1 }
  0x4a   : > { %v2201_v23 = vpack.c.b16 %v572_v33, %v571_v32  ;;  %v499_v29 = vrot.slane %v498_v21, 4  ;;  %v731_v32 = vsel %vm2120_vm6, %v1608_v25, %v730_v16  ;;  %v768_v22 = vunpack.c.l.b16 %v738_v8 }
  0x4b   : > { %v766_v43 = vunpack.c.l.b16 %v731_v32  ;;  %v769_v24 = vunpack.c.l.b16 %v741_v9  ;;  %v2317_v9 = vld [vmem:[%s2044_s6 + $0x68] sm:$0x1] }
  0x4c   : > { %v504_v38 = vsel %vm2124_vm7, %v499_v29, %v503_v14 }
  0x4d   : > { %v575_v42 = vunpack.c.l.b16 %v504_v38  ;;  %v2287_v32 = vpack.c.b16 %v769_v24, %v768_v22  ;;  %v559_v38 = vshll.u32 %v2285_v31, 16 }
  0x4e   : > { %1597 = vmatmul.msk.bf16.gmra.mxu1 %vm274_vm1, %v582_v34  ;;  %1614 = vmatmul.msk.bf16.gmra.mxu2 %vm274_vm1, %v2171_v5  ;;  %v470_v34 = vrot.slane %v468_v26, 4  ;;  %v732_v26 = vrot.slane %v730_v16, 4 }
  0x4f   : > { %1627 = vmatmul.msk.bf16.gmra.mxu3 %vm274_vm1, %v2047_v10  ;;  %1636 = vmatmul.msk.bf16.gmra.mxu0 %vm274_vm1, %v2174_v13 }
  0x50   : > { %v474_v46 = vor.u32 %v473_v35, %v470_v34  ;;  %v734_v33 = vsel %vm2120_vm6, %v732_v26, %v733_v27  ;;  %v516_v34 = vshrl.u32 %v201_v20, 16  ;;  %v519_v35 = vshll.u32 %v201_v20, 16 }
  0x52   : > { %v475_v52 = vrot.slane %v474_v46, 4  ;;  %v767_v46 = vunpack.c.l.b16 %v734_v33  ;;  %v518_v49 = vrot.slane %v516_v34, 4  ;;  %v521_v50 = vrot.slane %v519_v35, 5  ;;  %v225_v35 = vld [vmem:[%s2044_s6 + $0x48] sm:$0xe] }
  0x53   : > { %v744_v33 = vrot.slane %v2243_v28, 5 }
  0x54   : > { %v480_v58 = vsel %vm2124_vm7, %v475_v52, %v479_v36  ;;  %v525_v36 = vshll.u32 %v2243_v28, 16  ;;  %v576_v52 = vunpack.c.l.b16 %v514_v40  ;;  %v2257_v54 = vpack.c.b16 %v767_v46, %v766_v43 }
  0x55   : > { %v573_v6 = vunpack.c.l.b16 %v480_v58  ;;  %v522_v57 = vor.u32 %v521_v50, %v518_v49  ;;  %v1610_v40 = vrot.slane %v225_v35, 9  ;;  %v746_v43 = vrot.slane %v744_v33, 4 }
  0x56   : > { %v527_v41 = vrot.slane %v525_v36, 5  ;;  %v2260_v60 = vpack.c.b16 %v576_v52, %v575_v42  ;;  %v747_v28 = vrot.slane %v215_v48, 5  ;;  %v561_v50 = vrot.slane %v559_v38, 5 }
  0x57   : > { %v2231_v19 = vpack.c.b16 %v574_v7, %v573_v6  ;;  %v523_v55 = vrot.slane %v522_v57, 4  ;;  %v203_v6 = vld [vmem:[%s2044_s6 + $0x54] sm:$0xf]  ;;  %v2272_v7 = vld [vmem:[%s2044_s6 + $0x58] sm:$0xf]  ;;  %v745_v42 = vsel %vm2120_vm6, %v1610_v40, %v744_v33 }
  0x58   : > { %v532_v58 = vor.u32 %v531_v51, %v527_v41  ;;  %v540_v16 = vshrl.u32 %v203_v6, 16  ;;  %v543_v17 = vshll.u32 %v203_v6, 16  ;;  %v549_v18 = vshll.u32 %v2272_v7, 16  ;;  %v2304_v51 = vld [vmem:[%s2044_s6 + $0x64] sm:$0xf] }
  0x59   : > { %v528_v14 = vsel %vm2124_vm7, %v523_v55, %v527_v41  ;;  %v553_v21 = vshrl.u32 %v2272_v7, 16  ;;  %v205_v41 = vld [vmem:[%s2044_s6 + $0x60] sm:$0xf]  ;;  %v748_v52 = vsel %vm2120_vm6, %v746_v43, %v747_v28  ;;  %v966_v59 = vshrl.u32 %v2304_v51, 16 }
  0x5a   : > { %v533_v2 = vrot.slane %v532_v58, 4  ;;  %v577_v25 = vunpack.c.l.b16 %v528_v14  ;;  %v542_v27 = vrot.slane %v540_v16, 4  ;;  %v545_v20 = vrot.slane %v543_v17, 5 }
  0x5b   : > { %v551_v29 = vrot.slane %v549_v18, 5  ;;  %v555_v30 = vrot.slane %v553_v21, 4  ;;  %v953_v48 = vshrl.u32 %v205_v41, 16  ;;  %v956_v57 = vshll.u32 %v205_v41, 16  ;;  %v226_v21 = vld [vmem:[%s2044_s6 + $0x54] sm:$0xe] }
  0x5c   : > { %v538_v15 = vsel %vm2124_vm7, %v533_v2, %v537_v3  ;;  %v546_v36 = vor.u32 %v545_v20, %v542_v27  ;;  %v962_v58 = vshll.u32 %v2304_v51, 16  ;;  %v770_v61 = vunpack.c.l.b16 %v745_v42  ;;  %v2340_v20 = vld [vmem:[%s2603_s2] ss:$0 sm:$0xff] }
  0x5d   : > { %v578_v26 = vunpack.c.l.b16 %v538_v15  ;;  %v556_v37 = vor.u32 %v555_v30, %v551_v29  ;;  %v771_v0 = vunpack.c.l.b16 %v748_v52  ;;  %v955_v2 = vrot.slane %v953_v48, 4 }
  0x5e   : > { %1598 = vmatmul.msk.bf16.gmra.mxu1 %vm274_vm1, %v2174_v13  ;;  %1615 = vmatmul.msk.bf16.gmra.mxu2 %vm274_vm1, %v2198_v39  ;;  %v547_v46 = vrot.slane %v546_v36, 4  ;;  %v958_v3 = vrot.slane %v956_v57, 5  ;;  %v964_v6 = vrot.slane %v962_v58, 5  ;;  %v968_v8 = vrot.slane %v966_v59, 4 }
  0x5f   : > { %1628 = vmatmul.msk.bf16.gmra.mxu3 %vm274_vm1, %v2096_v44  ;;  %1637 = vmatmul.msk.bf16.gmra.mxu0 %vm274_vm1, %v2201_v23  ;;  %v2290_v34 = vpack.c.b16 %v578_v26, %v577_v25  ;;  %v557_v49 = vrot.slane %v556_v37, 4  ;;  %v2319_v14 = vpack.c.b16 %v771_v0, %v770_v61  ;;  %v751_v17 = vrot.slane %v2272_v7, 5  ;;  %v2369_v61 = vld [vmem:[%s2044_s6 + $0x60] sm:$0xff] }
  0x60   : > { %v552_v53 = vsel %vm2124_vm7, %v547_v46, %v551_v29  ;;  %v959_v22 = vor.u32 %v958_v3, %v955_v2  ;;  %v969_v24 = vor.u32 %v968_v8, %v964_v6  ;;  %v972_v25 = vshll.u32 %v2317_v9, 16 }
  0x61   : > { %v562_v56 = vsel %vm2124_vm7, %v557_v49, %v561_v50  ;;  %v579_v1 = vunpack.c.l.b16 %v552_v53  ;;  %v1611_v26 = vrot.slane %v226_v21, 9  ;;  %v753_v7 = vrot.slane %v751_v17, 4 }
  0x62   : > { %v580_v55 = vunpack.c.l.b16 %v562_v56  ;;  %v754_v27 = vrot.slane %v2285_v31, 5  ;;  %v960_v29 = vrot.slane %v959_v22, 4  ;;  %v970_v30 = vrot.slane %v969_v24, 4 }
  0x63   : > { %v974_v33 = vrot.slane %v972_v25, 5  ;;  %v752_v31 = vsel %vm2120_vm6, %v1611_v26, %v751_v17 }
  0x64   : > { %v2323_v16 = vpack.c.b16 %v580_v55, %v579_v1  ;;  %v755_v43 = vsel %vm2120_vm6, %v753_v7, %v754_v27  ;;  %v965_v46 = vsel %vm2124_vm7, %v960_v29, %v964_v6  ;;  %v772_v50 = vunpack.c.l.b16 %v752_v31 }
  0x65   : > { %v975_v49 = vsel %vm2124_vm7, %v970_v30, %v974_v33  ;;  %v773_v41 = vunpack.c.l.b16 %v755_v43  ;;  %v978_v42 = vunpack.c.l.b16 %v965_v46 }
  0x66   : > { %v979_v52 = vunpack.c.l.b16 %v975_v49 }
  0x67   : > { %v2361_v57 = vpack.c.b16 %v773_v41, %v772_v50 }
  0x68   : > { %v2371_v0 = vpack.c.b16 %v979_v52, %v978_v42 }
  0x6e   : > { %1599 = vmatmul.msk.bf16.gmra.mxu1 %vm274_vm1, %v2201_v23  ;;  %1616 = vmatmul.msk.bf16.gmra.mxu2 %vm274_vm1, %v2228_v4 }
  0x6f   : > { %1629 = vmatmul.msk.bf16.gmra.mxu3 %vm274_vm1, %v2050_v11  ;;  %1638 = vmatmul.msk.bf16.gmra.mxu0 %vm274_vm1, %v2231_v19 }
  0x7e   : > { %1600 = vmatmul.msk.bf16.gmra.mxu1 %vm274_vm1, %v2231_v19  ;;  %1617 = vmatmul.msk.bf16.gmra.mxu2 %vm274_vm1, %v2257_v54 }
  0x7f   : > { %1630 = vmatmul.msk.bf16.gmra.mxu3 %vm274_vm1, %v2099_v45  ;;  %1639 = vmatmul.msk.bf16.gmra.mxu0 %vm274_vm1, %v2260_v60 }
  0x8e   : > { %1601 = vmatmul.msk.bf16.gmra.mxu1 %vm274_vm1, %v2260_v60  ;;  %1618 = vmatmul.msk.bf16.gmra.mxu2 %vm274_vm1, %v2287_v32 }
  0x8f   : > { %1631 = vmatmul.msk.bf16.gmra.mxu3 %vm274_vm1, %v2053_v12  ;;  %1640 = vmatmul.msk.bf16.gmra.mxu0 %vm274_vm1, %v2290_v34 }
  0x9b   : > { %v2321_v15 = vpop.f32.mrf.mxu1 }
  0x9c   : > { %v312_v18 = vpop.f32.mrf.mxu0 }
  0x9d   : > { %v352_v22 = vadd.f32 %v2340_v20, %v312_v18 }
  0x9e   : > { %1602 = vmatmul.msk.bf16.gmra.mxu1 %vm274_vm1, %v2290_v34  ;;  %1619 = vmatmul.msk.bf16.gmra.mxu2 %vm274_vm1, %v2319_v14 }
  0x9f   : > { %1632 = vmatmul.msk.bf16.gmra.mxu3 %vm274_vm1, %v2103_v47  ;;  %1641 = vmatmul.msk.bf16.gmra.mxu0 %vm274_vm1, %v2323_v16 }
  0xa1   : > { %v332_v35 = vpop.f32.mrf.mxu2 }
  0xa2   : > { %v2343_v36 = vadd.f32 %v2340_v20, %v332_v35  ;;  %v342_v37 = vpop.f32.mrf.mxu3 }
  0xa3   : > { %v2346_v38 = vadd.f32 %v2340_v20, %v342_v37  ;;  %v2348_v40 = vpop.f32.mrf.mxu1 }
  0xa4   : > { %v314_v28 = vpop.f32.mrf.mxu0 }
  0xa5   : > { %v353_v30 = vadd.f32 %v2340_v20, %v314_v28 }
  0xa9   : > { %v334_v53 = vpop.f32.mrf.mxu2 }
  0xaa   : > { %v2359_v56 = vadd.f32 %v2340_v20, %v334_v53  ;;  %v344_v48 = vpop.f32.mrf.mxu3 }
  0xab   : > { %v2364_v58 = vadd.f32 %v2340_v20, %v344_v48  ;;  %v2366_v59 = vpop.f32.mrf.mxu1 }
  0xac   : > { %v317_v1 = vpop.f32.mrf.mxu0 }
  0xae   : > { %1603 = vmatmul.msk.bf16.gmra.mxu1 %vm274_vm1, %v2323_v16  ;;  %1620 = vmatmul.msk.bf16.gmra.mxu2 %vm274_vm1, %v2361_v57 }
  0xaf   : > { %1633 = vmatmul.msk.bf16.gmra.mxu3 %vm274_vm1, %v2369_v61  ;;  %1642 = vmatmul.msk.bf16.gmra.mxu0 %vm274_vm1, %v2371_v0 }
  0xb1   : > { %v337_v55 = vpop.f32.mrf.mxu2 }
  0xb2   : > { %v2382_v2 = vadd.f32 %v2340_v20, %v337_v55  ;;  %v347_v3 = vpop.f32.mrf.mxu3 }
  0xb3   : > { %v2385_v6 = vadd.f32 %v2340_v20, %v347_v3  ;;  %v2387_v8 = vpop.f32.mrf.mxu1 }
  0xb4   : > { %v319_v17 = vpop.f32.mrf.mxu0 }
  0xb9   : > { %v339_v21 = vpop.f32.mrf.mxu2 }
  0xba   : > { %v2391_v24 = vadd.f32 %v2340_v20, %v339_v21  ;;  %v349_v25 = vpop.f32.mrf.mxu3 }
  0xbb   : > { %v2394_v26 = vadd.f32 %v2340_v20, %v349_v25  ;;  %v625_v7 = vpop.f32.mrf.mxu1 }
  0xbc   : > { %v665_v27 = vadd.f32 %v625_v7, %v352_v22  ;;  %v996_v29 = vpop.f32.mrf.mxu0 }
  0xbe   : > { %1645 = vmatmul.msk.bf16.vlgmr.msra.gmra.mxu1 %vm274_vm1, %v2171_v5  ;;  %1658 = vmatmul.msk.bf16.vlgmr.msra.gmra.mxu2 %vm274_vm1, %v2047_v10  ;;  %v354_v10 = vadd.f32 %v2340_v20, %v317_v1  ;;  %v355_v1 = vadd.f32 %v2340_v20, %v319_v17 }
  0xbf   : > { %1667 = vmatmul.msk.bf16.vlgmr.msra.gmra.mxu3 %vm274_vm1, %v2174_v13  ;;  %1677 = vmatmul.msk.bf16.vlgmr.msra.gmra.mxu0 %vm274_vm1, %v2198_v39 }
  0xc1   : > { %v818_v18 = vpop.f32.mrf.mxu2 }
  0xc2   : > { %v858_v33 = vadd.f32 %v818_v18, %v665_v27  ;;  %v896_v35 = vpop.f32.mrf.mxu3  ;;  %v356_v27 = vadd.f32 %v2340_v20, %v2321_v15 }
  0xc3   : > { %v627_v37 = vpop.f32.mrf.mxu1 }
  0xc4   : > { %v936_v31 = vadd.f32 %v896_v35, %v858_v33  ;;  %v666_v43 = vadd.f32 %v627_v37, %v353_v30  ;;  %v998_v46 = vpop.f32.mrf.mxu0  ;;  %v357_v37 = vadd.f32 %v2340_v20, %v2348_v40 }
  0xc6   : > { %v2405_v49 = vadd.f32 %v996_v29, %v936_v31 }
  0xc9   : > { %v820_v5 = vpop.f32.mrf.mxu2 }
  0xca   : > { %v859_v50 = vadd.f32 %v820_v5, %v666_v43  ;;  %v898_v41 = vpop.f32.mrf.mxu3 }
  0xcb   : > { %v630_v13 = vpop.f32.mrf.mxu1 }
  0xcc   : > { %v937_v42 = vadd.f32 %v898_v41, %v859_v50  ;;  %v667_v52 = vadd.f32 %v630_v13, %v354_v10  ;;  %v1001_v53 = vpop.f32.mrf.mxu0  ;;  %v358_v41 = vadd.f32 %v2340_v20, %v2366_v59 }
  0xce   : > { %1646 = vmatmul.msk.bf16.gmra.mxu1 %vm274_vm1, %v2198_v39  ;;  %1659 = vmatmul.msk.bf16.gmra.mxu2 %vm274_vm1, %v2096_v44  ;;  %v2412_v28 = vadd.f32 %v998_v46, %v937_v42 }
  0xcf   : > { %1668 = vmatmul.msk.bf16.gmra.mxu3 %vm274_vm1, %v2201_v23  ;;  %1678 = vmatmul.msk.bf16.gmra.mxu0 %vm274_vm1, %v2228_v4 }
  0xd1   : > { %v823_v48 = vpop.f32.mrf.mxu2 }
  0xd2   : > { %v860_v55 = vadd.f32 %v823_v48, %v667_v52  ;;  %v901_v3 = vpop.f32.mrf.mxu3 }
  0xd3   : > { %v632_v21 = vpop.f32.mrf.mxu1 }
  0xd4   : > { %v938_v22 = vadd.f32 %v901_v3, %v860_v55  ;;  %v668_v25 = vadd.f32 %v632_v21, %v355_v1  ;;  %v1003_v39 = vpop.f32.mrf.mxu0  ;;  %v359_v1 = vadd.f32 %v2340_v20, %v2387_v8 }
  0xd6   : > { %v2419_v7 = vadd.f32 %v1001_v53, %v938_v22 }
  0xd9   : > { %v825_v44 = vpop.f32.mrf.mxu2 }
  0xda   : > { %v861_v29 = vadd.f32 %v825_v44, %v668_v25  ;;  %v903_v23 = vpop.f32.mrf.mxu3 }
  0xdb   : > { %v635_v18 = vpop.f32.mrf.mxu1 }
  0xdc   : > { %v939_v30 = vadd.f32 %v903_v23, %v861_v29  ;;  %v669_v33 = vadd.f32 %v635_v18, %v356_v27  ;;  %v1006_v35 = vpop.f32.mrf.mxu0 }
  0xde   : > { %1647 = vmatmul.msk.bf16.gmra.mxu1 %vm274_vm1, %v2228_v4  ;;  %1660 = vmatmul.msk.bf16.gmra.mxu2 %vm274_vm1, %v2050_v11  ;;  %v2427_v17 = vadd.f32 %v1003_v39, %v939_v30 }
  0xdf   : > { %1669 = vmatmul.msk.bf16.gmra.mxu3 %vm274_vm1, %v2231_v19  ;;  %1679 = vmatmul.msk.bf16.gmra.mxu0 %vm274_vm1, %v2257_v54 }
  0xe1   : > { %v828_v15 = vpop.f32.mrf.mxu2 }
  0xe2   : > { %v862_v31 = vadd.f32 %v828_v15, %v669_v33  ;;  %v906_v43 = vpop.f32.mrf.mxu3 }
  0xe3   : > { %v637_v46 = vpop.f32.mrf.mxu1 }
  0xe4   : > { %v940_v5 = vadd.f32 %v906_v43, %v862_v31  ;;  %v670_v4 = vadd.f32 %v637_v46, %v357_v37  ;;  %v1008_v10 = vpop.f32.mrf.mxu0 }
  0xe6   : > { %v2435_v50 = vadd.f32 %v1006_v35, %v940_v5  ;;  %v227_v5 = vld [vmem:[%s2044_s6 + $0x60] sm:$0xe] }
  0xe9   : > { %v830_v11 = vpop.f32.mrf.mxu2 }
  0xea   : > { %v863_v19 = vadd.f32 %v830_v11, %v670_v4  ;;  %v908_v13 = vpop.f32.mrf.mxu3 }
  0xeb   : > { %v640_v42 = vpop.f32.mrf.mxu1 }
  0xec   : > { %v941_v52 = vadd.f32 %v908_v13, %v863_v19  ;;  %v671_v53 = vadd.f32 %v640_v42, %v358_v41  ;;  %v1011_v48 = vpop.f32.mrf.mxu0  ;;  %v1059_v41 = vrot.slane %v2317_v9, 5 }
  0xee   : > { %1648 = vmatmul.msk.bf16.gmra.mxu1 %vm274_vm1, %v2257_v54  ;;  %1661 = vmatmul.msk.bf16.gmra.mxu2 %vm274_vm1, %v2099_v45  ;;  %v2443_v40 = vadd.f32 %v1008_v10, %v941_v52 }
  0xef   : > { %1670 = vmatmul.msk.bf16.gmra.mxu3 %vm274_vm1, %v2260_v60  ;;  %1680 = vmatmul.msk.bf16.gmra.mxu0 %vm274_vm1, %v2287_v32 }
  0xf1   : > { %v833_v59 = vpop.f32.mrf.mxu2 }
  0xf2   : > { %v864_v55 = vadd.f32 %v833_v59, %v671_v53  ;;  %v911_v3 = vpop.f32.mrf.mxu3 }
  0xf3   : > { %v642_v21 = vpop.f32.mrf.mxu1 }
  0xf4   : > { %v942_v22 = vadd.f32 %v911_v3, %v864_v55  ;;  %v672_v54 = vadd.f32 %v642_v21, %v359_v1  ;;  %v1013_v25 = vpop.f32.mrf.mxu0 }
  0xf6   : > { %v2451_v39 = vadd.f32 %v1011_v48, %v942_v22 }
  0xf9   : > { %v835_v45 = vpop.f32.mrf.mxu2 }
  0xfa   : > { %v865_v44 = vadd.f32 %v835_v45, %v672_v54  ;;  %v913_v27 = vpop.f32.mrf.mxu3 }
  0xfb   : > { %v645_v29 = vpop.f32.mrf.mxu1 }
  0xfc   : > { %v943_v60 = vadd.f32 %v913_v27, %v865_v44  ;;  %v673_v23 = vadd.f32 %v645_v29, %v2343_v36  ;;  %v1016_v18 = vpop.f32.mrf.mxu0 }
  0xfe   : > { %1649 = vmatmul.msk.bf16.gmra.mxu1 %vm274_vm1, %v2287_v32  ;;  %1662 = vmatmul.msk.bf16.gmra.mxu2 %vm274_vm1, %v2053_v12  ;;  %v2458_v20 = vadd.f32 %v1013_v25, %v943_v60  ;;  %v218_v60 = vld [vmem:[%s2044_s6 + $0x74] sm:$0x1] }
  0xff   : > { %1671 = vmatmul.msk.bf16.gmra.mxu3 %vm274_vm1, %v2290_v34  ;;  %1681 = vmatmul.msk.bf16.gmra.mxu0 %vm274_vm1, %v2319_v14  ;;  %v1056_v34 = vrot.slane %v2304_v51, 5  ;;  %v207_v51 = vld [vmem:[%s2044_s6 + $0x6c] sm:$0xf] }
 0x100   : > { %v1216_v48 = vshrl.u32 %v207_v51, 16  ;;  %v1219_v59 = vshll.u32 %v207_v51, 16 }
 0x101   : > { %v838_v8 = vpop.f32.mrf.mxu2  ;;  %v1058_v19 = vrot.slane %v1056_v34, 4 }
 0x102   : > { %v866_v30 = vadd.f32 %v838_v8, %v673_v23  ;;  %v916_v33 = vpop.f32.mrf.mxu3  ;;  %v1218_v45 = vrot.slane %v1216_v48, 4  ;;  %v1221_v44 = vrot.slane %v1219_v59, 5 }
 0x103   : > { %v647_v36 = vpop.f32.mrf.mxu1 }
 0x104   : > { %v944_v35 = vadd.f32 %v916_v33, %v866_v30  ;;  %v674_v15 = vadd.f32 %v647_v36, %v2359_v56  ;;  %v1018_v32 = vpop.f32.mrf.mxu0  ;;  %v1643_v56 = vrot.slane %v227_v5, 9  ;;  %v1222_v36 = vor.u32 %v1221_v44, %v1218_v45 }
 0x106   : > { %v2465_v37 = vadd.f32 %v1016_v18, %v944_v35 }
 0x109   : > { %v840_v12 = vpop.f32.mrf.mxu2 }
 0x10a   : > { %v867_v31 = vadd.f32 %v840_v12, %v674_v15  ;;  %v918_v43 = vpop.f32.mrf.mxu3  ;;  %v1235_v15 = vshll.u32 %v218_v60, 16 }
 0x10b   : > { %v650_v46 = vpop.f32.mrf.mxu1 }
 0x10c   : > { %v945_v4 = vadd.f32 %v918_v43, %v867_v31  ;;  %v675_v10 = vadd.f32 %v650_v46, %v2382_v2  ;;  %v1021_v11 = vpop.f32.mrf.mxu0  ;;  %v208_v2 = vld [vmem:[%s2044_s6 + $0x70] sm:$0xf]  ;;  %v228_v43 = vld [vmem:[%s2044_s6 + $0x6c] sm:$0xe]  ;;  %v1223_v46 = vrot.slane %v1222_v36, 4 }
 0x10d   : > { %v1225_v1 = vshll.u32 %v208_v2, 16  ;;  %v1319_v31 = vrot.slane %v208_v2, 5 }
 0x10e   : > { %1650 = vmatmul.msk.bf16.gmra.mxu1 %vm274_vm1, %v2319_v14  ;;  %1663 = vmatmul.msk.bf16.gmra.mxu2 %vm274_vm1, %v2103_v47  ;;  %v2475_v13 = vadd.f32 %v1018_v32, %v945_v4  ;;  %v1057_v14 = vsel %vm2120_vm6, %v1643_v56, %v1056_v34  ;;  %v1060_v47 = vsel %vm2120_vm6, %v1058_v19, %v1059_v41  ;;  %v1237_v4 = vrot.slane %v1235_v15, 5 }
 0x10f   : > { %1672 = vmatmul.msk.bf16.gmra.mxu3 %vm274_vm1, %v2323_v16  ;;  %1682 = vmatmul.msk.bf16.gmra.mxu0 %vm274_vm1, %v2361_v57  ;;  %v1229_v16 = vshrl.u32 %v208_v2, 16  ;;  %v1063_v22 = vunpack.c.l.b16 %v1057_v14  ;;  %v1064_v54 = vunpack.c.l.b16 %v1060_v47  ;;  %v1227_v27 = vrot.slane %v1225_v1, 5 }
 0x111   : > { %v843_v42 = vpop.f32.mrf.mxu2  ;;  %v1231_v29 = vrot.slane %v1229_v16, 4  ;;  %v1065_v33 = vpack.c.b16 %v1064_v54, %v1063_v22 }
 0x112   : > { %v868_v9 = vadd.f32 %v843_v42, %v675_v10  ;;  %v921_v52 = vpop.f32.mrf.mxu3  ;;  %v1321_v10 = vrot.slane %v1319_v31, 4 }
 0x113   : > { %v652_v53 = vpop.f32.mrf.mxu1  ;;  %v1232_v35 = vor.u32 %v1231_v29, %v1227_v27 }
 0x114   : > { %v946_v55 = vadd.f32 %v921_v52, %v868_v9  ;;  %v676_v3 = vadd.f32 %v652_v53, %v2391_v24  ;;  %v1023_v21 = vpop.f32.mrf.mxu0 }
 0x115   : > { %v1233_v5 = vrot.slane %v1232_v35, 4 }
 0x116   : > { %v2488_v25 = vadd.f32 %v1021_v11, %v946_v55  ;;  %v1322_v11 = vrot.slane %v218_v60, 5  ;;  %v1702_v55 = vld [vmem:[%s2044_s6 + $0x6c] sm:$0xff]  ;;  %s1703_s6 = sshll.u32 %s1907_s15, 4 }
 0x117   : > { %v1238_v51 = vsel %vm2124_vm7, %v1233_v5, %v1237_v4  ;;  %s1461_s8 = sadd.s32 %s1703_s6, %s1688_s7  ;;  %s1849_s6 = scalar_lea.hbm %s2604_s3, 256 }
 0x118   : > { %v1323_v52 = vsel %vm2120_vm6, %v1321_v10, %v1322_v11  ;;  %v1242_v53 = vunpack.c.l.b16 %v1238_v51  ;;  %s1689_s9 = sshll.u32 %s1461_s8, 2 }
 0x119   : > { %v845_v23 = vpop.f32.mrf.mxu2  ;;  %v1327_v59 = vunpack.c.l.b16 %v1323_v52  ;;  %s1463_s15 = scalar_lea.hbm %s2604_s3, %s1689_s9 }
 0x11a   : > { %v869_v18 = vadd.f32 %v845_v23, %v676_v3  ;;  %v923_v8 = vpop.f32.mrf.mxu3  ;;  %s1466_s20 = sshll.u32 %s1463_s15, 4  ;;  %s1467_s20 = int_to_ptr.hbm [resolvable:$true] %s1466_s20 }
 0x11b   : > { %v655_v30 = vpop.f32.mrf.mxu1  ;;  %s1843_s24 = sshra.s32 %s1467_s20, 4  ;;  %s1844_s24 = int_to_ptr.hbm [resolvable:$true] %s1843_s24 }
 0x11c   : > { %v947_v24 = vadd.f32 %v923_v8, %v869_v18  ;;  %v677_v32 = vadd.f32 %v655_v30, %v2346_v38  ;;  %v1026_v12 = vpop.f32.mrf.mxu0  ;;  %v1675_v38 = vrot.slane %v228_v43, 9  ;;  %s1845_s27 = scalar_lea.hbm %s1844_s24, 64  ;;  %p1850_p2 = scmp.lt.s32.totalorder %s1844_s24, %s2604_s3 }
 0x11d   : > { %p1846_p13 = scmp.ne.s32.totalorder %s1844_s24, %s1845_s27  ;;  %p1851_p4 = scmp.lt.s32.totalorder %s1849_s6, %s1845_s27 }
 0x11e   : > { %1651 = vmatmul.msk.bf16.gmra.mxu1 %vm274_vm1, %v2361_v57  ;;  %1664 = vmatmul.msk.bf16.gmra.mxu2 %vm274_vm1, %v2369_v61  ;;  %v2497_v34 = vadd.f32 %v1023_v21, %v947_v24  ;;  %v1228_v61 = vsel %vm2124_vm7, %v1223_v46, %v1227_v27  ;;  %v1320_v9 = vsel %vm2120_vm6, %v1675_v38, %v1319_v31 }
 0x11f   : > { %1673 = vmatmul.msk.bf16.gmra.mxu3 %vm274_vm1, %v2371_v0  ;;  %1683 = vmatmul.msk.bf16.gmra.mxu0 %vm274_vm1, %v1065_v33  ;;  %v1241_v47 = vunpack.c.l.b16 %v1228_v61  ;;  %v1326_v48 = vunpack.c.l.b16 %v1320_v9  ;;  %p1847_p0 = pnand %p1846_p13, %p1998_p3  ;;  %p1852_p5 = por %p1851_p4, %p1850_p2 }
 0x121   : > { %v848_v41 = vpop.f32.mrf.mxu2  ;;  %v1243_v21 = vpack.c.b16 %v1242_v53, %v1241_v47  ;;  %p1848_p1 = pneg %p1847_p0 }
 0x122   : > { %v870_v56 = vadd.f32 %v848_v41, %v677_v32  ;;  %v926_v19 = vpop.f32.mrf.mxu3 }
 0x123   : > { %v657_v57 = vpop.f32.mrf.mxu1  ;;  %p1853_p6 = pnand %p1852_p5, %p1848_p1 }
 0x124   : > { %v948_v0 = vadd.f32 %v926_v19, %v870_v56  ;;  %v678_v2 = vadd.f32 %v657_v57, %v2364_v58  ;;  %v1028_v42 = vpop.f32.mrf.mxu0  ;;  %v1328_v58 = vpack.c.b16 %v1327_v59, %v1326_v48 }
 0x126   : > { %v2511_v14 = vadd.f32 %v1026_v12, %v948_v0 }
 0x129   : > { %v850_v1 = vpop.f32.mrf.mxu2 }
 0x12a   : > { %v871_v16 = vadd.f32 %v850_v1, %v678_v2  ;;  %v928_v63 = vpop.f32.mrf.mxu3 }
 0x12b   : > { %v660_v3 = vpop.f32.mrf.mxu1 }
 0x12c   : > { %v949_v22 = vadd.f32 %v928_v63, %v871_v16  ;;  %v679_v54 = vadd.f32 %v660_v3, %v2385_v6  ;;  %v1031_v45 = vpop.f32.mrf.mxu0 }
 0x12e   : > { %1652 = vmatmul.msk.bf16.gmra.mxu1 %vm274_vm1, %v1065_v33  ;;  %1665 = vmatmul.msk.bf16.gmra.mxu2 %vm274_vm1, %v1702_v55  ;;  %v2517_v62 = vadd.f32 %v1028_v42, %v949_v22 }
 0x12f   : > { %1674 = vmatmul.msk.bf16.gmra.mxu3 %vm274_vm1, %v1243_v21  ;;  %1684 = vmatmul.msk.bf16.gmra.mxu0 %vm274_vm1, %v1328_v58 }
 0x131   : > { %v853_v44 = vpop.f32.mrf.mxu2 }
 0x132   : > { %v872_v27 = vadd.f32 %v853_v44, %v679_v54  ;;  %v931_v29 = vpop.f32.mrf.mxu3 }
 0x133   : > { %v662_v60 = vpop.f32.mrf.mxu1 }
 0x134   : > { %v950_v23 = vadd.f32 %v931_v29, %v872_v27  ;;  %v680_v18 = vadd.f32 %v662_v60, %v2394_v26  ;;  %v1033_v8 = vpop.f32.mrf.mxu0 }
 0x136   : > { %v2522_v6 = vadd.f32 %v1031_v45, %v950_v23 }
 0x139   : > { %v855_v30 = vpop.f32.mrf.mxu2 }
 0x13a   : > { %v873_v33 = vadd.f32 %v855_v30, %v680_v18  ;;  %v933_v36 = vpop.f32.mrf.mxu3 }
 0x13b   : > { %v1081_v35 = vpop.f32.mrf.mxu1 }
 0x13c   : > { %v951_v15 = vadd.f32 %v933_v36, %v873_v33  ;;  %v1344_v24 = vpop.f32.mrf.mxu0  ;;  %v1121_v31 = vadd.f32 %v1081_v35, %v2405_v49 }
 0x13e   : > { %v2524_v32 = vadd.f32 %v1033_v8, %v951_v15 }
 0x141   : > { %v1159_v12 = vpop.f32.mrf.mxu2 }
 0x142   : > { %v1259_v43 = vpop.f32.mrf.mxu3  ;;  %v1199_v5 = vadd.f32 %v1159_v12, %v1121_v31 }
 0x143   : > { %v1083_v46 = vpop.f32.mrf.mxu1 }
 0x144   : > { %v1346_v26 = vpop.f32.mrf.mxu0  ;;  %v1299_v4 = vadd.f32 %v1259_v43, %v1199_v5  ;;  %v1122_v38 = vadd.f32 %v1083_v46, %v2412_v28 }
 0x146   : > { %v1384_v19 = vadd.f32 %v1344_v24, %v1299_v4 }
 0x148   : > { %v1400_v0 = vmax.f32 %v1384_v19, 0.0 }
 0x149   : > { %v1161_v10 = vpop.f32.mrf.mxu2 }
 0x14a   : > { %v1200_v11 = vadd.f32 %v1161_v10, %v1122_v38  ;;  %v1261_v41 = vpop.f32.mrf.mxu3 }
 0x14b   : > { %v1086_v56 = vpop.f32.mrf.mxu1 }
 0x14c   : > { %v1300_v57 = vadd.f32 %v1261_v41, %v1200_v11  ;;  %v1349_v61 = vpop.f32.mrf.mxu0  ;;  %v1123_v9 = vadd.f32 %v1086_v56, %v2419_v7 }
 0x14e   : > { %v1385_v51 = vadd.f32 %v1346_v26, %v1300_v57 }
 0x150   : > { %v1401_v49 = vmax.f32 %v1385_v51, 0.0 }
 0x151   : > { %v1164_v2 = vpop.f32.mrf.mxu2 }
 0x152   : > { %v1707_v42 = vpack.c.bf16 %v1401_v49, %v1400_v0  ;;  %v1264_v52 = vpop.f32.mrf.mxu3  ;;  %v1201_v28 = vadd.f32 %v1164_v2, %v1123_v9 }
 0x153   : > { %v1088_v47 = vpop.f32.mrf.mxu1 }
 0x154   : > { %1708 = vst [vmem:[%s2532_s5] sm:$0xff] %v1707_v42   ;;  %v1351_v53 = vpop.f32.mrf.mxu0  ;;  %v1301_v48 = vadd.f32 %v1264_v52, %v1201_v28  ;;  %v1124_v59 = vadd.f32 %v1088_v47, %v2427_v17 }
 0x156   : > { %v1386_v3 = vadd.f32 %v1349_v61, %v1301_v48 }
 0x158   : > { %v1402_v22 = vmax.f32 %v1386_v3, 0.0 }
 0x159   : > { %v1166_v1 = vpop.f32.mrf.mxu2 }
 0x15a   : > { %v1202_v16 = vadd.f32 %v1166_v1, %v1124_v59  ;;  %v1266_v63 = vpop.f32.mrf.mxu3 }
 0x15b   : > { %v1091_v55 = vpop.f32.mrf.mxu1 }
 0x15c   : > { %v1302_v21 = vadd.f32 %v1266_v63, %v1202_v16  ;;  %v1354_v58 = vpop.f32.mrf.mxu0  ;;  %v1125_v27 = vadd.f32 %v1091_v55, %v2435_v50 }
 0x15e   : > { %v1387_v7 = vadd.f32 %v1351_v53, %v1302_v21 }
 0x160   : > { %v1403_v54 = vmax.f32 %v1387_v7, 0.0 }
 0x161   : > { %v1169_v45 = vpop.f32.mrf.mxu2 }
 0x162   : > { %v1712_v44 = vpack.c.bf16 %v1403_v54, %v1402_v22  ;;  %v1269_v29 = vpop.f32.mrf.mxu3  ;;  %v1203_v23 = vadd.f32 %v1169_v45, %v1125_v27 }
 0x163   : > { %v1093_v60 = vpop.f32.mrf.mxu1 }
 0x164   : > { %1744 = vst [vmem:[%s2532_s5 + $0x8] sm:$0xff] %v1712_v44   ;;  %v1356_v17 = vpop.f32.mrf.mxu0  ;;  %v1303_v18 = vadd.f32 %v1269_v29, %v1203_v23  ;;  %v1126_v8 = vadd.f32 %v1093_v60, %v2443_v40 }
 0x166   : > { %v1388_v15 = vadd.f32 %v1354_v58, %v1303_v18 }
 0x168   : > { %v1404_v43 = vmax.f32 %v1388_v15, 0.0 }
 0x169   : > { %v1171_v30 = vpop.f32.mrf.mxu2 }
 0x16a   : > { %v1204_v33 = vadd.f32 %v1171_v30, %v1126_v8  ;;  %v1271_v36 = vpop.f32.mrf.mxu3 }
 0x16b   : > { %v1096_v35 = vpop.f32.mrf.mxu1 }
 0x16c   : > { %v1304_v24 = vadd.f32 %v1271_v36, %v1204_v33  ;;  %v1359_v12 = vpop.f32.mrf.mxu0  ;;  %v1127_v26 = vadd.f32 %v1096_v35, %v2451_v39 }
 0x16e   : > { %v1389_v31 = vadd.f32 %v1356_v17, %v1304_v24 }
 0x170   : > { %v1405_v46 = vmax.f32 %v1389_v31, 0.0 }
 0x171   : > { %v1174_v50 = vpop.f32.mrf.mxu2 }
 0x172   : > { %v1717_v5 = vpack.c.bf16 %v1405_v46, %v1404_v43  ;;  %v1274_v4 = vpop.f32.mrf.mxu3  ;;  %v1205_v10 = vadd.f32 %v1174_v50, %v1127_v26 }
 0x173   : > { %v1098_v38 = vpop.f32.mrf.mxu1 }
 0x174   : > { %1745 = vst [vmem:[%s2532_s5 + $0x10] sm:$0xff] %v1717_v5   ;;  %v1361_v40 = vpop.f32.mrf.mxu0  ;;  %v1305_v11 = vadd.f32 %v1274_v4, %v1205_v10  ;;  %v1128_v41 = vadd.f32 %v1098_v38, %v2458_v20 }
 0x176   : > { %v1390_v51 = vadd.f32 %v1359_v12, %v1305_v11 }
 0x178   : > { %v1406_v42 = vmax.f32 %v1390_v51, 0.0 }
 0x179   : > { %v1176_v56 = vpop.f32.mrf.mxu2 }
 0x17a   : > { %v1206_v19 = vadd.f32 %v1176_v56, %v1128_v41  ;;  %v1276_v57 = vpop.f32.mrf.mxu3 }
 0x17b   : > { %v1101_v61 = vpop.f32.mrf.mxu1 }
 0x17c   : > { %v1306_v0 = vadd.f32 %v1276_v57, %v1206_v19  ;;  %v1364_v49 = vpop.f32.mrf.mxu0  ;;  %v1129_v47 = vadd.f32 %v1101_v61, %v2465_v37 }
 0x17e   : > { %v1391_v2 = vadd.f32 %v1361_v40, %v1306_v0 }
 0x180   : > { %v1407_v9 = vmax.f32 %v1391_v2, 0.0 }
 0x181   : > { %v1179_v39 = vpop.f32.mrf.mxu2 }
 0x182   : > { %v1722_v52 = vpack.c.bf16 %v1407_v9, %v1406_v42  ;;  %v1279_v28 = vpop.f32.mrf.mxu3  ;;  %v1207_v48 = vadd.f32 %v1179_v39, %v1129_v47 }
 0x183   : > { %v1103_v53 = vpop.f32.mrf.mxu1 }
 0x184   : > { %1746 = vst [vmem:[%s2532_s5 + $0x18] sm:$0xff] %v1722_v52   ;;  %v1366_v20 = vpop.f32.mrf.mxu0  ;;  %v1307_v59 = vadd.f32 %v1279_v28, %v1207_v48  ;;  %v1130_v1 = vadd.f32 %v1103_v53, %v2475_v13 }
 0x186   : > { %v1392_v21 = vadd.f32 %v1364_v49, %v1307_v59 }
 0x188   : > { %v1408_v54 = vmax.f32 %v1392_v21, 0.0 }
 0x189   : > { %v1181_v16 = vpop.f32.mrf.mxu2 }
 0x18a   : > { %v1208_v63 = vadd.f32 %v1181_v16, %v1130_v1  ;;  %v1281_v55 = vpop.f32.mrf.mxu3 }
 0x18b   : > { %v1106_v3 = vpop.f32.mrf.mxu1 }
 0x18c   : > { %v1308_v58 = vadd.f32 %v1281_v55, %v1208_v63  ;;  %v1369_v7 = vpop.f32.mrf.mxu0  ;;  %v1131_v27 = vadd.f32 %v1106_v3, %v2488_v25 }
 0x18e   : > { %v1393_v22 = vadd.f32 %v1366_v20, %v1308_v58 }
 0x190   : > { %v1409_v45 = vmax.f32 %v1393_v22, 0.0 }
 0x191   : > { %v1184_v37 = vpop.f32.mrf.mxu2 }
 0x192   : > { %v1727_v44 = vpack.c.bf16 %v1409_v45, %v1408_v54  ;;  %v1284_v29 = vpop.f32.mrf.mxu3  ;;  %v1209_v23 = vadd.f32 %v1184_v37, %v1131_v27 }
 0x193   : > { %v1108_v60 = vpop.f32.mrf.mxu1 }
 0x194   : > { %1747 = vst [vmem:[%s2532_s5 + $0x20] sm:$0xff] %v1727_v44   ;;  %v1371_v13 = vpop.f32.mrf.mxu0  ;;  %v1309_v17 = vadd.f32 %v1284_v29, %v1209_v23  ;;  %v1132_v18 = vadd.f32 %v1108_v60, %v2497_v34 }
 0x196   : > { %v1394_v35 = vadd.f32 %v1369_v7, %v1309_v17 }
 0x198   : > { %v1410_v31 = vmax.f32 %v1394_v35, 0.0 }
 0x199   : > { %v1186_v8 = vpop.f32.mrf.mxu2 }
 0x19a   : > { %v1210_v30 = vadd.f32 %v1186_v8, %v1132_v18  ;;  %v1286_v33 = vpop.f32.mrf.mxu3 }
 0x19b   : > { %v1111_v36 = vpop.f32.mrf.mxu1 }
 0x19c   : > { %v1310_v15 = vadd.f32 %v1286_v33, %v1210_v30  ;;  %v1374_v12 = vpop.f32.mrf.mxu0  ;;  %v1133_v50 = vadd.f32 %v1111_v36, %v2511_v14 }
 0x19e   : > { %v1395_v24 = vadd.f32 %v1371_v13, %v1310_v15 }
 0x1a0   : > { %v1411_v43 = vmax.f32 %v1395_v24, 0.0 }
 0x1a1   : > { %v1189_v25 = vpop.f32.mrf.mxu2 }
 0x1a2   : > { %v1732_v46 = vpack.c.bf16 %v1411_v43, %v1410_v31  ;;  %v1289_v5 = vpop.f32.mrf.mxu3  ;;  %v1211_v4 = vadd.f32 %v1189_v25, %v1133_v50 }
 0x1a3   : > { %v1113_v26 = vpop.f32.mrf.mxu1 }
 0x1a4   : > { %1748 = vst [vmem:[%s2532_s5 + $0x28] sm:$0xff] %v1732_v46   ;;  %v1311_v34 = vadd.f32 %v1289_v5, %v1211_v4  ;;  %v1134_v38 = vadd.f32 %v1113_v26, %v2517_v62  ;;  %v1376_v10 = vpop.f32.mrf.mxu0 }
 0x1a6   : > { %v1396_v19 = vadd.f32 %v1374_v12, %v1311_v34 }
 0x1a8   : > { %v1412_v51 = vmax.f32 %v1396_v19, 0.0 }
 0x1a9   : > { %v1191_v40 = vpop.f32.mrf.mxu2 }
 0x1aa   : > { %v1212_v11 = vadd.f32 %v1191_v40, %v1134_v38  ;;  %v1291_v41 = vpop.f32.mrf.mxu3 }
 0x1ab   : > { %v1116_v56 = vpop.f32.mrf.mxu1 }
 0x1ac   : > { %v1312_v57 = vadd.f32 %v1291_v41, %v1212_v11  ;;  %v1135_v2 = vadd.f32 %v1116_v56, %v2522_v6  ;;  %v1379_v62 = vpop.f32.mrf.mxu0 }
 0x1ae   : > { %v1397_v61 = vadd.f32 %v1376_v10, %v1312_v57 }
 0x1b0   : > { %v1413_v14 = vmax.f32 %v1397_v61, 0.0 }
 0x1b1   : > { %v1194_v0 = vpop.f32.mrf.mxu2 }
 0x1b2   : > { %v1737_v49 = vpack.c.bf16 %v1413_v14, %v1412_v51  ;;  %v1294_v42 = vpop.f32.mrf.mxu3  ;;  %v1213_v9 = vadd.f32 %v1194_v0, %v1135_v2 }
 0x1b3   : > { %v1118_v39 = vpop.f32.mrf.mxu1 }
 0x1b4   : > { %1749 = vst [vmem:[%s2532_s5 + $0x30] sm:$0xff] %v1737_v49   ;;  %v1313_v52 = vadd.f32 %v1294_v42, %v1213_v9  ;;  %v1136_v47 = vadd.f32 %v1118_v39, %v2524_v32  ;;  %v1381_v59 = vpop.f32.mrf.mxu0 }
 0x1b6   : > { %v1398_v6 = vadd.f32 %v1379_v62, %v1313_v52 }
 0x1b8   : > { %v1414_v16 = vmax.f32 %v1398_v6, 0.0 }
 0x1b9   : > { %v1196_v28 = vpop.f32.mrf.mxu2 }
 0x1ba   : > { %v1214_v53 = vadd.f32 %v1196_v28, %v1136_v47  ;;  %v1296_v48 = vpop.f32.mrf.mxu3 }
 0x1bc   : > { %v1314_v20 = vadd.f32 %v1296_v48, %v1214_v53 }
 0x1be   : > { %v1399_v1 = vadd.f32 %v1381_v59, %v1314_v20 }
 0x1c0   : > { %v1415_v63 = vmax.f32 %v1399_v1, 0.0 }
 0x1c2   : > { %v1742_v32 = vpack.c.bf16 %v1415_v63, %v1414_v16 }
 0x1c4   : > { %1750 = vst [vmem:[%s2532_s5 + $0x38] sm:$0xff] %v1742_v32  }
 0x1c5   : > { %1856 = shalt.err (!%p1853_p6)
}
 0x1c6   : > { %s1925_s29 = smov 64   ;;  %s1926_s5 = smov 4  }
 0x1c7   : > { %1755 = dma.vmem_to_hbm [thread:$0]  (%p1998_p3), %s1465_s16, 1024, %s1467_s20, %s1449_s21, %s1925_s29, %s1925_s29, %s1926_s5  }
 0x1c8 PF: > { %p1761_p7 = scmp.ge.s32.totalorder %s1923_s19, 2  ;;  %s1481_s9 = sand.u32 1, %s1895_s12  }
 0x1c9   : > { %s1482_s10 = scalar_lea.sflag [#allocation3], %s1481_s9 }
 0x1ca   : > { %p1758_p9 = pnand %p1761_p7, %p2007_p8 }
 0x1cc   : > { %p1759_p10 = pneg %p1758_p9 }
 0x1ce   : > { %1890 = dma.done.wait (%p1759_p10), %s1482_s10, 1024  }
 0x1cf   : > { %1892 = vsyncadd (%p1759_p10), %s1482_s10, 4294966272  ;;  %s16_s19 = sadd.s32 1, %s1923_s19   ;;  %s2611_s12 = smov %s1899_s13 }
 0x1d0   : > { %p13_p11 = scmp.ge.s32.totalorder %s16_s19, 6   ;;  %s2612_s13 = smov %s1903_s14 }
 0x1d1   : > { %s2613_s14 = smov %s2016_s30  ;;  %s2614_s15 = smov %s1915_s17 }
 0x1d2   : > { %s2615_s16 = smov %s1919_s18  ;;  %s2616_s17 = smov %s2619_s22 }
 0x1d3   : > { %s2617_s18 = smov %s2623_s23  ;;  %15 = sbr.rel (!%p13_p11) target bundleno = 5 (0x5), region = 76 }
 0x1d8   :  { %1488 = vsyncpa [#allocation3], 1 }
 0x1d9   :  { %1490 = vsyncpa [#allocation3 + $0x1], 1 }

</bundles_post_ra>
